<compile_context>
chip_gen: v5e
topology: v5e:2x2
jax: 0.10.0
libtpu: 0.0.40
codegen_flags: <defaults>
</compile_context>

<pallas_src>
import functools

import jax
import jax.numpy as jnp
from jax.experimental import pallas as pl
from jax.experimental.pallas import tpu as pltpu


def _round_up(x, m):
    return ((x + m - 1) // m) * m


def _image_proj_kernel(x_ref, w_ref, b_ref, g_ref, beta_ref, o_ref,
                       *, tokens_per_step, cross_dim, eps):
    """(tm, C) row tile x (C, tpg*cd) weight slab -> tpg LayerNormed token slices.

    Per-token structure (dot -> LN -> scale/shift -> store) keeps peak live f32 at
    roughly (tm, cd) and hands the scheduler independent MXU/VPU chains so token
    t+1's matmul hides token t's LayerNorm epilogue.
    """
    x = x_ref[...]                                    # native dtype (bf16 preferred)
    gamma = g_ref[...].astype(jnp.float32)            # (1, cd) -- hoisted once
    beta = beta_ref[...].astype(jnp.float32)          # (1, cd)
    inv_cd = jnp.float32(1.0 / cross_dim)             # hoisted constant

    for t in range(tokens_per_step):                  # small & static
        lo = t * cross_dim
        # MXU: native-dtype operands with f32 accumulation; W sliced lane-statically.
        y = jnp.dot(x, w_ref[:, lo:lo + cross_dim],
                    preferred_element_type=jnp.float32)            # (tm, cd) f32
        # Bias folded into the per-token slice path: one (1, cd) broadcast per token.
        y = y + b_ref[:, lo:lo + cross_dim].astype(jnp.float32)
        # LayerNorm over the cd lanes (biased variance, like torch.nn.LayerNorm).
        mean = jnp.sum(y, axis=-1, keepdims=True) * inv_cd
        cen = y - mean
        var = jnp.sum(cen * cen, axis=-1, keepdims=True) * inv_cd
        out_t = cen * jax.lax.rsqrt(var + eps) * gamma + beta      # rsqrt -> EUP slot
        # Direct lane-dense store of the cd-wide slice (cd is a multiple of 128 in
        # production -> unmasked vst); no concatenate / full-width copy.
        o_ref[:, lo:lo + cross_dim] = out_t.astype(o_ref.dtype)


def image_proj_model(image_embeds, proj_w, proj_b, ln_gamma, ln_beta,
                     *, clip_extra_context_tokens, cross_attention_dim,
                     tm=256, tokens_per_step=None, eps=1e-5,
                     out_dtype=None, matmul_dtype=None):
    """Pallas implementation of ImageProjModel.forward.

    image_embeds: (B, C) or (B, N, C)
    proj_w:       (C, clip_extra_context_tokens * cross_attention_dim)
    proj_b:       (clip_extra_context_tokens * cross_attention_dim,)
    ln_gamma / ln_beta: (cross_attention_dim,)
    matmul_dtype: optional dtype for the MXU operands (pass jnp.bfloat16 in
                  production -- accumulation stays f32 either way).
    Returns: (B, N * clip_extra_context_tokens, cross_attention_dim)
    """
    if image_embeds.ndim == 3:
        B, N, C = image_embeds.shape
    else:
        B, C = image_embeds.shape
        N = 1
    n_tok = int(clip_extra_context_tokens)
    cd = int(cross_attention_dim)
    out_dim = n_tok * cd
    assert proj_w.shape == (C, out_dim)
    out_dtype = image_embeds.dtype if out_dtype is None else out_dtype

    M = B * N
    x2d = image_embeds.reshape(M, C)
    if matmul_dtype is not None:
        x2d = x2d.astype(matmul_dtype)
        proj_w = proj_w.astype(matmul_dtype)

    isz = lambda d: jnp.dtype(d).itemsize

    # Row tile: multiple of the sublane packing for the matmul dtype; ragged M is
    # zero-padded and sliced back (LN on zero rows is NaN-safe: rsqrt(0 + eps)).
    row_align = {4: 8, 2: 16, 1: 32}.get(isz(x2d.dtype), 8)
    tm = max(row_align, min(int(tm), _round_up(M, row_align)))
    tm = _round_up(tm, row_align)

    # Physical VMEM: 64 MiB on v7x, 128 MiB on v5e/v6e; budget at ~85% of it.
    try:
        phys_vmem = int(pltpu.get_tpu_info().vmem_capacity_bytes)
    except Exception:
        phys_vmem = 64 << 20                      # conservative (v7x) fallback

    budget = phys_vmem * 85 // 100

    def vmem_est(tm_, tpg_):
        tn_ = tpg_ * cd
        w_buf = 1 if tpg_ == n_tok else 2         # Buffered(1) when grid-invariant
        return (2 * tm_ * C * isz(x2d.dtype)              # x row tile (double-buffered)
                + w_buf * C * tn_ * isz(proj_w.dtype)     # W slab
                + w_buf * tn_ * isz(proj_b.dtype)         # bias slab
                + 2 * cd * 4                              # gamma + beta
                + 2 * tm_ * tn_ * isz(out_dtype)          # output tile
                + 6 * tm_ * cd * 4)                       # live f32 LN intermediates

    # Tokens per grid step: largest divisor of n_tok whose footprint fits the VMEM
    # budget; shrink tm only if even a single-token slab is too large.
    if tokens_per_step is not None:
        tpg = int(tokens_per_step)
        assert n_tok % tpg == 0
    else:
        tpg = n_tok
        for d in range(n_tok, 0, -1):
            if n_tok % d != 0:
                continue
            tpg = d
            if vmem_est(tm, tpg) <= budget:
                break
    while vmem_est(tm, tpg) > budget and tm > row_align:
        tm = _round_up(max(row_align, tm // 2), row_align)

    m_pad = _round_up(M, tm)
    if m_pad != M:
        x2d = jnp.pad(x2d, ((0, m_pad - M), (0, 0)))

    tn = tpg * cd
    n_row_tiles = m_pad // tm
    n_tok_groups = n_tok // tpg
    w_invariant = n_tok_groups == 1

    bias2d = proj_b.reshape(1, out_dim)
    gamma2d = ln_gamma.reshape(1, cd)
    beta2d = ln_beta.reshape(1, cd)

    kernel = functools.partial(_image_proj_kernel,
                               tokens_per_step=tpg, cross_dim=cd, eps=float(eps))

    # Always set the scoped-VMEM limit explicitly (v5e default is 16 MiB, v6e/v7x
    # 32 MiB) and clamp it to physical capacity with headroom.
    vmem_limit = int(min(max(vmem_est(tm, tpg) * 5 // 4, 32 << 20),
                         phys_vmem * 9 // 10))

    w_bytes = C * out_dim * isz(proj_w.dtype)
    cost = pl.CostEstimate(
        flops=2 * m_pad * C * out_dim + 10 * m_pad * out_dim,
        transcendentals=m_pad * n_tok,
        bytes_accessed=(m_pad * C * isz(x2d.dtype)
                        + (w_bytes if w_invariant else w_bytes * n_row_tiles)
                        + out_dim * isz(proj_b.dtype) + 2 * cd * 4
                        + m_pad * out_dim * isz(out_dtype)),
    )

    def _in_specs(use_buffered):
        def once(shape, imap):
            if use_buffered:
                return pl.BlockSpec(shape, imap, pipeline_mode=pl.Buffered(1))
            return pl.BlockSpec(shape, imap)

        w_imap, b_imap = (lambda i, j: (0, j)), (lambda i, j: (0, j))
        w_spec = once((C, tn), w_imap) if w_invariant else pl.BlockSpec((C, tn), w_imap)
        b_spec = once((1, tn), b_imap) if w_invariant else pl.BlockSpec((1, tn), b_imap)
        return [
            pl.BlockSpec((tm, C), lambda i, j: (i, 0)),   # x row tile (j-invariant)
            w_spec,                                        # W token-group slab
            b_spec,                                        # bias slab
            once((1, cd), lambda i, j: (0, 0)),            # gamma (grid-invariant)
            once((1, cd), lambda i, j: (0, 0)),            # beta  (grid-invariant)
        ]

    def _run(use_buffered):
        return pl.pallas_call(
            kernel,
            out_shape=jax.ShapeDtypeStruct((m_pad, out_dim), out_dtype),
            grid_spec=pltpu.PrefetchScalarGridSpec(
                num_scalar_prefetch=0,
                grid=(n_row_tiles, n_tok_groups),
                in_specs=_in_specs(use_buffered),
                out_specs=pl.BlockSpec((tm, tn), lambda i, j: (i, j)),
            ),
            compiler_params=pltpu.CompilerParams(
                # No reduction axis: every (row-tile, token-group) block is
                # independent, so both axes shard across TCs on v7x megacore.
                dimension_semantics=("parallel", "parallel"),
                vmem_limit_bytes=vmem_limit,
            ),
            cost_estimate=cost,
        )(x2d, proj_w, bias2d, gamma2d, beta2d)

    try:
        out2d = _run(use_buffered=True)
    except Exception:
        # pl.Buffered(1) is a pure-VMEM optimization for grid-invariant blocks;
        # fall back to default double-buffering if this Mosaic build rejects it.
        out2d = _run(use_buffered=False)

    out2d = out2d[:M]
    # '(b nt) n c -> b (nt n) c' with nt = N image tokens (outer), n = n_tok generated
    # context tokens (inner)  ==  (B, N, n_tok, cd) -> (B, N*n_tok, cd).
    return out2d.reshape(B, N, n_tok, cd).reshape(B, N * n_tok, cd)


def _reference(image_embeds, proj_w, proj_b, ln_gamma, ln_beta,
               *, clip_extra_context_tokens, cross_attention_dim, eps=1e-5):
    if image_embeds.ndim == 3:
        B, N, C = image_embeds.shape
    else:
        B, C = image_embeds.shape
        N = 1
    n_tok, cd = clip_extra_context_tokens, cross_attention_dim
    x = image_embeds.reshape(B * N, C).astype(jnp.float32)
    y = x @ proj_w.astype(jnp.float32) + proj_b.astype(jnp.float32)
    y = y.reshape(-1, n_tok, cd)
    mean = jnp.mean(y, axis=-1, keepdims=True)
    var = jnp.mean((y - mean) ** 2, axis=-1, keepdims=True)
    y = (y - mean) * jax.lax.rsqrt(var + eps) * ln_gamma.astype(jnp.float32) \
        + ln_beta.astype(jnp.float32)
    return y.reshape(B, N, n_tok, cd).reshape(B, N * n_tok, cd)


if __name__ == "__main__":
    # Small shapes consistent with the module (real sizes: C=1024/1280, cd=768..2048).
    B, N = 2, 12                      # 24 rows -> exercises ragged-row padding
    clip_embeddings_dim = 256
    cross_attention_dim = 128
    clip_extra_context_tokens = 4

    key = jax.random.PRNGKey(0)
    k_x, k_w, k_b, k_g, k_beta = jax.random.split(key, 5)

    x_f32 = jax.random.normal(k_x, (B, N, clip_embeddings_dim), dtype=jnp.float32)
    w_f32 = 0.02 * jax.random.normal(
        k_w, (clip_embeddings_dim,
              clip_extra_context_tokens * cross_attention_dim), dtype=jnp.float32)
    proj_b = 0.01 * jax.random.normal(
        k_b, (clip_extra_context_tokens * cross_attention_dim,), dtype=jnp.float32)
    ln_gamma = 1.0 + 0.01 * jax.random.normal(
        k_g, (cross_attention_dim,), dtype=jnp.float32)
    ln_beta = 0.01 * jax.random.normal(
        k_beta, (cross_attention_dim,), dtype=jnp.float32)

    kw = dict(clip_extra_context_tokens=clip_extra_context_tokens,
              cross_attention_dim=cross_attention_dim)

    # 1) Production-like path: bf16 MXU operands, f32 accumulation, single token group.
    x_bf16 = x_f32.astype(jnp.bfloat16)
    w_bf16 = w_f32.astype(jnp.bfloat16)
    out_bf16 = jax.block_until_ready(
        image_proj_model(x_bf16, w_bf16, proj_b, ln_gamma, ln_beta, **kw))
    ref_bf16 = _reference(x_bf16, w_bf16, proj_b, ln_gamma, ln_beta, **kw)
    assert out_bf16.shape == (B, N * clip_extra_context_tokens, cross_attention_dim)
    assert out_bf16.dtype == jnp.bfloat16
    assert jnp.allclose(out_bf16.astype(jnp.float32), ref_bf16, atol=5e-2, rtol=5e-2)

    # 2) f32 path with a tiny row tile and forced 2-token groups so the ragged-row
    #    padding and the 2-D (row-tiles x token-groups) grid are exercised at demo
    #    scale (defaults: tm=256, all tokens in one group when VMEM allows).
    out_f32 = jax.block_until_ready(
        image_proj_model(x_f32, w_f32, proj_b, ln_gamma, ln_beta,
                         tm=16, tokens_per_step=2, **kw))
    ref_f32 = _reference(x_f32, w_f32, proj_b, ln_gamma, ln_beta, **kw)
    assert out_f32.shape == (B, N * clip_extra_context_tokens, cross_attention_dim)
    assert jnp.allclose(out_f32, ref_f32, atol=1e-3, rtol=1e-3)

    print("KERNEL_OK")
</pallas_src>

<mosaic_0001>
module attributes {stable_mosaic.version = 11 : i64} {
  func.func @_image_proj_kernel(%arg0: i32, %arg1: i32, %arg2: memref<32x256xbf16, #tpu.memory_space<vmem>>, %arg3: memref<256x512xbf16, #tpu.memory_space<vmem>>, %arg4: memref<1x512xf32, #tpu.memory_space<vmem>>, %arg5: memref<1x128xf32, #tpu.memory_space<vmem>>, %arg6: memref<1x128xf32, #tpu.memory_space<vmem>>, %arg7: memref<32x512xbf16, #tpu.memory_space<vmem>>) attributes {dimension_semantics = [#tpu.dimension_semantics<parallel>, #tpu.dimension_semantics<parallel>], iteration_bounds = array<i64: 1, 1>, scalar_prefetch = 0 : i64, scratch_operands = 0 : i64, tpu.core_type = #tpu.core_type<tc>, window_params = [{transform_indices = @transform_0, window_bounds = array<i64: 32, 256>}, {pipeline_mode = #tpu.pipeline_mode<synchronous>, transform_indices = @transform_1, window_bounds = array<i64: 256, 512>}, {pipeline_mode = #tpu.pipeline_mode<synchronous>, transform_indices = @transform_2, window_bounds = array<i64: 1, 512>}, {pipeline_mode = #tpu.pipeline_mode<synchronous>, transform_indices = @transform_3, window_bounds = array<i64: 1, 128>}, {pipeline_mode = #tpu.pipeline_mode<synchronous>, transform_indices = @transform_4, window_bounds = array<i64: 1, 128>}, {transform_indices = @transform_5, window_bounds = array<i64: 32, 512>}]} {
    %c0 = arith.constant 0 : index
    %c0_0 = arith.constant 0 : index
    %0 = vector.load %arg2[%c0, %c0_0] : memref<32x256xbf16, #tpu.memory_space<vmem>>, vector<32x256xbf16>
    %c0_1 = arith.constant 0 : index
    %c0_2 = arith.constant 0 : index
    %1 = vector.load %arg5[%c0_1, %c0_2] : memref<1x128xf32, #tpu.memory_space<vmem>>, vector<1x128xf32>
    %c0_3 = arith.constant 0 : index
    %c0_4 = arith.constant 0 : index
    %2 = vector.load %arg6[%c0_3, %c0_4] : memref<1x128xf32, #tpu.memory_space<vmem>>, vector<1x128xf32>
    %c0_5 = arith.constant 0 : index
    %c0_6 = arith.constant 0 : index
    %3 = vector.load %arg3[%c0_5, %c0_6] : memref<256x512xbf16, #tpu.memory_space<vmem>>, vector<256x128xbf16>
    %cst = arith.constant dense<0.000000e+00> : vector<32x128xf32>
    %4 = tpu.matmul %0, %3, %cst {dimension_numbers = #tpu.dot_dimension_numbers<[1], [0], [0], [1], [0, 0, 1, 1], [], []>} : vector<32x256xbf16>, vector<256x128xbf16>, vector<32x128xf32> -> vector<32x128xf32>
    %c0_7 = arith.constant 0 : index
    %c0_8 = arith.constant 0 : index
    %5 = vector.load %arg4[%c0_7, %c0_8] : memref<1x512xf32, #tpu.memory_space<vmem>>, vector<1x128xf32>
    %6 = vector.broadcast %5 : vector<1x128xf32> to vector<32x128xf32>
    %7 = arith.addf %4, %6 : vector<32x128xf32>
    %cst_9 = arith.constant dense<0.000000e+00> : vector<32xf32>
    %8 = vector.multi_reduction <add>, %7, %cst_9 [1] : vector<32x128xf32> to vector<32xf32>
    %9 = vector.shape_cast %8 : vector<32xf32> to vector<32x1xf32>
    %cst_10 = arith.constant 7.812500e-03 : f32
    %10 = vector.broadcast %cst_10 : f32 to vector<32x1xf32>
    %11 = arith.mulf %9, %10 : vector<32x1xf32>
    %12 = vector.broadcast %11 : vector<32x1xf32> to vector<32x128xf32>
    %13 = arith.subf %7, %12 : vector<32x128xf32>
    %14 = arith.mulf %13, %13 : vector<32x128xf32>
    %cst_11 = arith.constant dense<0.000000e+00> : vector<32xf32>
    %15 = vector.multi_reduction <add>, %14, %cst_11 [1] : vector<32x128xf32> to vector<32xf32>
    %16 = vector.shape_cast %15 : vector<32xf32> to vector<32x1xf32>
    %cst_12 = arith.constant 7.812500e-03 : f32
    %17 = vector.broadcast %cst_12 : f32 to vector<32x1xf32>
    %18 = arith.mulf %16, %17 : vector<32x1xf32>
    %cst_13 = arith.constant 9.99999974E-6 : f32
    %19 = vector.broadcast %cst_13 : f32 to vector<32x1xf32>
    %20 = arith.addf %18, %19 : vector<32x1xf32>
    %21 = math.rsqrt %20 : vector<32x1xf32>
    %22 = vector.broadcast %21 : vector<32x1xf32> to vector<32x128xf32>
    %23 = arith.mulf %13, %22 : vector<32x128xf32>
    %24 = vector.broadcast %1 : vector<1x128xf32> to vector<32x128xf32>
    %25 = arith.mulf %23, %24 : vector<32x128xf32>
    %26 = vector.broadcast %2 : vector<1x128xf32> to vector<32x128xf32>
    %27 = arith.addf %25, %26 : vector<32x128xf32>
    %28 = arith.truncf %27 : vector<32x128xf32> to vector<32x128xbf16>
    %c0_14 = arith.constant 0 : index
    %c0_15 = arith.constant 0 : index
    %29 = vector.load %arg7[%c0_14, %c0_15] : memref<32x512xbf16, #tpu.memory_space<vmem>>, vector<32x128xbf16>
    tpu.vector_store %arg7[%c0_14, %c0_15], %28 {strides = array<i32>} : memref<32x512xbf16, #tpu.memory_space<vmem>>, vector<32x128xbf16>,
    %c0_16 = arith.constant 0 : index
    %c128 = arith.constant 128 : index
    %30 = vector.load %arg3[%c0_16, %c128] : memref<256x512xbf16, #tpu.memory_space<vmem>>, vector<256x128xbf16>
    %cst_17 = arith.constant dense<0.000000e+00> : vector<32x128xf32>
    %31 = tpu.matmul %0, %30, %cst_17 {dimension_numbers = #tpu.dot_dimension_numbers<[1], [0], [0], [1], [0, 0, 1, 1], [], []>} : vector<32x256xbf16>, vector<256x128xbf16>, vector<32x128xf32> -> vector<32x128xf32>
    %c0_18 = arith.constant 0 : index
    %c128_19 = arith.constant 128 : index
    %32 = vector.load %arg4[%c0_18, %c128_19] : memref<1x512xf32, #tpu.memory_space<vmem>>, vector<1x128xf32>
    %33 = vector.broadcast %32 : vector<1x128xf32> to vector<32x128xf32>
    %34 = arith.addf %31, %33 : vector<32x128xf32>
    %cst_20 = arith.constant dense<0.000000e+00> : vector<32xf32>
    %35 = vector.multi_reduction <add>, %34, %cst_20 [1] : vector<32x128xf32> to vector<32xf32>
    %36 = vector.shape_cast %35 : vector<32xf32> to vector<32x1xf32>
    %cst_21 = arith.constant 7.812500e-03 : f32
    %37 = vector.broadcast %cst_21 : f32 to vector<32x1xf32>
    %38 = arith.mulf %36, %37 : vector<32x1xf32>
    %39 = vector.broadcast %38 : vector<32x1xf32> to vector<32x128xf32>
    %40 = arith.subf %34, %39 : vector<32x128xf32>
    %41 = arith.mulf %40, %40 : vector<32x128xf32>
    %cst_22 = arith.constant dense<0.000000e+00> : vector<32xf32>
    %42 = vector.multi_reduction <add>, %41, %cst_22 [1] : vector<32x128xf32> to vector<32xf32>
    %43 = vector.shape_cast %42 : vector<32xf32> to vector<32x1xf32>
    %cst_23 = arith.constant 7.812500e-03 : f32
    %44 = vector.broadcast %cst_23 : f32 to vector<32x1xf32>
    %45 = arith.mulf %43, %44 : vector<32x1xf32>
    %cst_24 = arith.constant 9.99999974E-6 : f32
    %46 = vector.broadcast %cst_24 : f32 to vector<32x1xf32>
    %47 = arith.addf %45, %46 : vector<32x1xf32>
    %48 = math.rsqrt %47 : vector<32x1xf32>
    %49 = vector.broadcast %48 : vector<32x1xf32> to vector<32x128xf32>
    %50 = arith.mulf %40, %49 : vector<32x128xf32>
    %51 = vector.broadcast %1 : vector<1x128xf32> to vector<32x128xf32>
    %52 = arith.mulf %50, %51 : vector<32x128xf32>
    %53 = vector.broadcast %2 : vector<1x128xf32> to vector<32x128xf32>
    %54 = arith.addf %52, %53 : vector<32x128xf32>
    %55 = arith.truncf %54 : vector<32x128xf32> to vector<32x128xbf16>
    %c0_25 = arith.constant 0 : index
    %c128_26 = arith.constant 128 : index
    %56 = vector.load %arg7[%c0_25, %c128_26] : memref<32x512xbf16, #tpu.memory_space<vmem>>, vector<32x128xbf16>
    tpu.vector_store %arg7[%c0_25, %c128_26], %55 {strides = array<i32>} : memref<32x512xbf16, #tpu.memory_space<vmem>>, vector<32x128xbf16>,
    %c0_27 = arith.constant 0 : index
    %c256 = arith.constant 256 : index
    %57 = vector.load %arg3[%c0_27, %c256] : memref<256x512xbf16, #tpu.memory_space<vmem>>, vector<256x128xbf16>
    %cst_28 = arith.constant dense<0.000000e+00> : vector<32x128xf32>
    %58 = tpu.matmul %0, %57, %cst_28 {dimension_numbers = #tpu.dot_dimension_numbers<[1], [0], [0], [1], [0, 0, 1, 1], [], []>} : vector<32x256xbf16>, vector<256x128xbf16>, vector<32x128xf32> -> vector<32x128xf32>
    %c0_29 = arith.constant 0 : index
    %c256_30 = arith.constant 256 : index
    %59 = vector.load %arg4[%c0_29, %c256_30] : memref<1x512xf32, #tpu.memory_space<vmem>>, vector<1x128xf32>
    %60 = vector.broadcast %59 : vector<1x128xf32> to vector<32x128xf32>
    %61 = arith.addf %58, %60 : vector<32x128xf32>
    %cst_31 = arith.constant dense<0.000000e+00> : vector<32xf32>
    %62 = vector.multi_reduction <add>, %61, %cst_31 [1] : vector<32x128xf32> to vector<32xf32>
    %63 = vector.shape_cast %62 : vector<32xf32> to vector<32x1xf32>
    %cst_32 = arith.constant 7.812500e-03 : f32
    %64 = vector.broadcast %cst_32 : f32 to vector<32x1xf32>
    %65 = arith.mulf %63, %64 : vector<32x1xf32>
    %66 = vector.broadcast %65 : vector<32x1xf32> to vector<32x128xf32>
    %67 = arith.subf %61, %66 : vector<32x128xf32>
    %68 = arith.mulf %67, %67 : vector<32x128xf32>
    %cst_33 = arith.constant dense<0.000000e+00> : vector<32xf32>
    %69 = vector.multi_reduction <add>, %68, %cst_33 [1] : vector<32x128xf32> to vector<32xf32>
    %70 = vector.shape_cast %69 : vector<32xf32> to vector<32x1xf32>
    %cst_34 = arith.constant 7.812500e-03 : f32
    %71 = vector.broadcast %cst_34 : f32 to vector<32x1xf32>
    %72 = arith.mulf %70, %71 : vector<32x1xf32>
    %cst_35 = arith.constant 9.99999974E-6 : f32
    %73 = vector.broadcast %cst_35 : f32 to vector<32x1xf32>
    %74 = arith.addf %72, %73 : vector<32x1xf32>
    %75 = math.rsqrt %74 : vector<32x1xf32>
    %76 = vector.broadcast %75 : vector<32x1xf32> to vector<32x128xf32>
    %77 = arith.mulf %67, %76 : vector<32x128xf32>
    %78 = vector.broadcast %1 : vector<1x128xf32> to vector<32x128xf32>
    %79 = arith.mulf %77, %78 : vector<32x128xf32>
    %80 = vector.broadcast %2 : vector<1x128xf32> to vector<32x128xf32>
    %81 = arith.addf %79, %80 : vector<32x128xf32>
    %82 = arith.truncf %81 : vector<32x128xf32> to vector<32x128xbf16>
    %c0_36 = arith.constant 0 : index
    %c256_37 = arith.constant 256 : index
    %83 = vector.load %arg7[%c0_36, %c256_37] : memref<32x512xbf16, #tpu.memory_space<vmem>>, vector<32x128xbf16>
    tpu.vector_store %arg7[%c0_36, %c256_37], %82 {strides = array<i32>} : memref<32x512xbf16, #tpu.memory_space<vmem>>, vector<32x128xbf16>,
    %c0_38 = arith.constant 0 : index
    %c384 = arith.constant 384 : index
    %84 = vector.load %arg3[%c0_38, %c384] : memref<256x512xbf16, #tpu.memory_space<vmem>>, vector<256x128xbf16>
    %cst_39 = arith.constant dense<0.000000e+00> : vector<32x128xf32>
    %85 = tpu.matmul %0, %84, %cst_39 {dimension_numbers = #tpu.dot_dimension_numbers<[1], [0], [0], [1], [0, 0, 1, 1], [], []>} : vector<32x256xbf16>, vector<256x128xbf16>, vector<32x128xf32> -> vector<32x128xf32>
    %c0_40 = arith.constant 0 : index
    %c384_41 = arith.constant 384 : index
    %86 = vector.load %arg4[%c0_40, %c384_41] : memref<1x512xf32, #tpu.memory_space<vmem>>, vector<1x128xf32>
    %87 = vector.broadcast %86 : vector<1x128xf32> to vector<32x128xf32>
    %88 = arith.addf %85, %87 : vector<32x128xf32>
    %cst_42 = arith.constant dense<0.000000e+00> : vector<32xf32>
    %89 = vector.multi_reduction <add>, %88, %cst_42 [1] : vector<32x128xf32> to vector<32xf32>
    %90 = vector.shape_cast %89 : vector<32xf32> to vector<32x1xf32>
    %cst_43 = arith.constant 7.812500e-03 : f32
    %91 = vector.broadcast %cst_43 : f32 to vector<32x1xf32>
    %92 = arith.mulf %90, %91 : vector<32x1xf32>
    %93 = vector.broadcast %92 : vector<32x1xf32> to vector<32x128xf32>
    %94 = arith.subf %88, %93 : vector<32x128xf32>
    %95 = arith.mulf %94, %94 : vector<32x128xf32>
    %cst_44 = arith.constant dense<0.000000e+00> : vector<32xf32>
    %96 = vector.multi_reduction <add>, %95, %cst_44 [1] : vector<32x128xf32> to vector<32xf32>
    %97 = vector.shape_cast %96 : vector<32xf32> to vector<32x1xf32>
    %cst_45 = arith.constant 7.812500e-03 : f32
    %98 = vector.broadcast %cst_45 : f32 to vector<32x1xf32>
    %99 = arith.mulf %97, %98 : vector<32x1xf32>
    %cst_46 = arith.constant 9.99999974E-6 : f32
    %100 = vector.broadcast %cst_46 : f32 to vector<32x1xf32>
    %101 = arith.addf %99, %100 : vector<32x1xf32>
    %102 = math.rsqrt %101 : vector<32x1xf32>
    %103 = vector.broadcast %102 : vector<32x1xf32> to vector<32x128xf32>
    %104 = arith.mulf %94, %103 : vector<32x128xf32>
    %105 = vector.broadcast %1 : vector<1x128xf32> to vector<32x128xf32>
    %106 = arith.mulf %104, %105 : vector<32x128xf32>
    %107 = vector.broadcast %2 : vector<1x128xf32> to vector<32x128xf32>
    %108 = arith.addf %106, %107 : vector<32x128xf32>
    %109 = arith.truncf %108 : vector<32x128xf32> to vector<32x128xbf16>
    %c0_47 = arith.constant 0 : index
    %c384_48 = arith.constant 384 : index
    %110 = vector.load %arg7[%c0_47, %c384_48] : memref<32x512xbf16, #tpu.memory_space<vmem>>, vector<32x128xbf16>
    tpu.vector_store %arg7[%c0_47, %c384_48], %109 {strides = array<i32>} : memref<32x512xbf16, #tpu.memory_space<vmem>>, vector<32x128xbf16>,
    return
  }
  func.func @transform_0(%arg0: i32, %arg1: i32) -> (i32, i32) {
    %c0_i32 = arith.constant 0 : i32
    %c0_i32_0 = arith.constant 0 : i32
    return %arg0, %c0_i32 : i32, i32
  }
  func.func @transform_1(%arg0: i32, %arg1: i32) -> (i32, i32) {
    %c0_i32 = arith.constant 0 : i32
    %c0_i32_0 = arith.constant 0 : i32
    return %c0_i32, %arg1 : i32, i32
  }
  func.func @transform_2(%arg0: i32, %arg1: i32) -> (i32, i32) {
    %c0_i32 = arith.constant 0 : i32
    %c0_i32_0 = arith.constant 0 : i32
    return %c0_i32, %arg1 : i32, i32
  }
  func.func @transform_3(%arg0: i32, %arg1: i32) -> (i32, i32) {
    %c0_i32 = arith.constant 0 : i32
    %c0_i32_0 = arith.constant 0 : i32
    %c0_i32_1 = arith.constant 0 : i32
    return %c0_i32, %c0_i32_0 : i32, i32
  }
  func.func @transform_4(%arg0: i32, %arg1: i32) -> (i32, i32) {
    %c0_i32 = arith.constant 0 : i32
    %c0_i32_0 = arith.constant 0 : i32
    %c0_i32_1 = arith.constant 0 : i32
    return %c0_i32, %c0_i32_0 : i32, i32
  }
  func.func @transform_5(%arg0: i32, %arg1: i32) -> (i32, i32) {
    %c0_i32 = arith.constant 0 : i32
    return %arg0, %arg1 : i32, i32
  }
}

module attributes {stable_mosaic.version = 11 : i64} {
  func.func @_image_proj_kernel(%arg0: i32, %arg1: i32, %arg2: memref<32x256xbf16, #tpu.memory_space<vmem>>, %arg3: memref<256x512xbf16, #tpu.memory_space<vmem>>, %arg4: memref<1x512xf32, #tpu.memory_space<vmem>>, %arg5: memref<1x128xf32, #tpu.memory_space<vmem>>, %arg6: memref<1x128xf32, #tpu.memory_space<vmem>>, %arg7: memref<32x512xbf16, #tpu.memory_space<vmem>>) attributes {dimension_semantics = [#tpu.dimension_semantics<parallel>, #tpu.dimension_semantics<parallel>], iteration_bounds = array<i64: 1, 1>, scalar_prefetch = 0 : i64, scratch_operands = 0 : i64, tpu.core_type = #tpu.core_type<tc>, window_params = [{transform_indices = @transform_0, window_bounds = array<i64: 32, 256>}, {transform_indices = @transform_1, window_bounds = array<i64: 256, 512>}, {transform_indices = @transform_2, window_bounds = array<i64: 1, 512>}, {pipeline_mode = #tpu.pipeline_mode<synchronous>, transform_indices = @transform_3, window_bounds = array<i64: 1, 128>}, {pipeline_mode = #tpu.pipeline_mode<synchronous>, transform_indices = @transform_4, window_bounds = array<i64: 1, 128>}, {transform_indices = @transform_5, window_bounds = array<i64: 32, 512>}]} {
    %c0 = arith.constant 0 : index
    %c0_0 = arith.constant 0 : index
    %0 = vector.load %arg2[%c0, %c0_0] : memref<32x256xbf16, #tpu.memory_space<vmem>>, vector<32x256xbf16>
    %c0_1 = arith.constant 0 : index
    %c0_2 = arith.constant 0 : index
    %1 = vector.load %arg5[%c0_1, %c0_2] : memref<1x128xf32, #tpu.memory_space<vmem>>, vector<1x128xf32>
    %c0_3 = arith.constant 0 : index
    %c0_4 = arith.constant 0 : index
    %2 = vector.load %arg6[%c0_3, %c0_4] : memref<1x128xf32, #tpu.memory_space<vmem>>, vector<1x128xf32>
    %c0_5 = arith.constant 0 : index
    %c0_6 = arith.constant 0 : index
    %3 = vector.load %arg3[%c0_5, %c0_6] : memref<256x512xbf16, #tpu.memory_space<vmem>>, vector<256x128xbf16>
    %cst = arith.constant dense<0.000000e+00> : vector<32x128xf32>
    %4 = tpu.matmul %0, %3, %cst {dimension_numbers = #tpu.dot_dimension_numbers<[1], [0], [0], [1], [0, 0, 1, 1], [], []>} : vector<32x256xbf16>, vector<256x128xbf16>, vector<32x128xf32> -> vector<32x128xf32>
    %c0_7 = arith.constant 0 : index
    %c0_8 = arith.constant 0 : index
    %5 = vector.load %arg4[%c0_7, %c0_8] : memref<1x512xf32, #tpu.memory_space<vmem>>, vector<1x128xf32>
    %6 = vector.broadcast %5 : vector<1x128xf32> to vector<32x128xf32>
    %7 = arith.addf %4, %6 : vector<32x128xf32>
    %cst_9 = arith.constant dense<0.000000e+00> : vector<32xf32>
    %8 = vector.multi_reduction <add>, %7, %cst_9 [1] : vector<32x128xf32> to vector<32xf32>
    %9 = vector.shape_cast %8 : vector<32xf32> to vector<32x1xf32>
    %cst_10 = arith.constant 7.812500e-03 : f32
    %10 = vector.broadcast %cst_10 : f32 to vector<32x1xf32>
    %11 = arith.mulf %9, %10 : vector<32x1xf32>
    %12 = vector.broadcast %11 : vector<32x1xf32> to vector<32x128xf32>
    %13 = arith.subf %7, %12 : vector<32x128xf32>
    %14 = arith.mulf %13, %13 : vector<32x128xf32>
    %cst_11 = arith.constant dense<0.000000e+00> : vector<32xf32>
    %15 = vector.multi_reduction <add>, %14, %cst_11 [1] : vector<32x128xf32> to vector<32xf32>
    %16 = vector.shape_cast %15 : vector<32xf32> to vector<32x1xf32>
    %cst_12 = arith.constant 7.812500e-03 : f32
    %17 = vector.broadcast %cst_12 : f32 to vector<32x1xf32>
    %18 = arith.mulf %16, %17 : vector<32x1xf32>
    %cst_13 = arith.constant 9.99999974E-6 : f32
    %19 = vector.broadcast %cst_13 : f32 to vector<32x1xf32>
    %20 = arith.addf %18, %19 : vector<32x1xf32>
    %21 = math.rsqrt %20 : vector<32x1xf32>
    %22 = vector.broadcast %21 : vector<32x1xf32> to vector<32x128xf32>
    %23 = arith.mulf %13, %22 : vector<32x128xf32>
    %24 = vector.broadcast %1 : vector<1x128xf32> to vector<32x128xf32>
    %25 = arith.mulf %23, %24 : vector<32x128xf32>
    %26 = vector.broadcast %2 : vector<1x128xf32> to vector<32x128xf32>
    %27 = arith.addf %25, %26 : vector<32x128xf32>
    %28 = arith.truncf %27 : vector<32x128xf32> to vector<32x128xbf16>
    %c0_14 = arith.constant 0 : index
    %c0_15 = arith.constant 0 : index
    %29 = vector.load %arg7[%c0_14, %c0_15] : memref<32x512xbf16, #tpu.memory_space<vmem>>, vector<32x128xbf16>
    tpu.vector_store %arg7[%c0_14, %c0_15], %28 {strides = array<i32>} : memref<32x512xbf16, #tpu.memory_space<vmem>>, vector<32x128xbf16>,
    %c0_16 = arith.constant 0 : index
    %c128 = arith.constant 128 : index
    %30 = vector.load %arg3[%c0_16, %c128] : memref<256x512xbf16, #tpu.memory_space<vmem>>, vector<256x128xbf16>
    %cst_17 = arith.constant dense<0.000000e+00> : vector<32x128xf32>
    %31 = tpu.matmul %0, %30, %cst_17 {dimension_numbers = #tpu.dot_dimension_numbers<[1], [0], [0], [1], [0, 0, 1, 1], [], []>} : vector<32x256xbf16>, vector<256x128xbf16>, vector<32x128xf32> -> vector<32x128xf32>
    %c0_18 = arith.constant 0 : index
    %c128_19 = arith.constant 128 : index
    %32 = vector.load %arg4[%c0_18, %c128_19] : memref<1x512xf32, #tpu.memory_space<vmem>>, vector<1x128xf32>
    %33 = vector.broadcast %32 : vector<1x128xf32> to vector<32x128xf32>
    %34 = arith.addf %31, %33 : vector<32x128xf32>
    %cst_20 = arith.constant dense<0.000000e+00> : vector<32xf32>
    %35 = vector.multi_reduction <add>, %34, %cst_20 [1] : vector<32x128xf32> to vector<32xf32>
    %36 = vector.shape_cast %35 : vector<32xf32> to vector<32x1xf32>
    %cst_21 = arith.constant 7.812500e-03 : f32
    %37 = vector.broadcast %cst_21 : f32 to vector<32x1xf32>
    %38 = arith.mulf %36, %37 : vector<32x1xf32>
    %39 = vector.broadcast %38 : vector<32x1xf32> to vector<32x128xf32>
    %40 = arith.subf %34, %39 : vector<32x128xf32>
    %41 = arith.mulf %40, %40 : vector<32x128xf32>
    %cst_22 = arith.constant dense<0.000000e+00> : vector<32xf32>
    %42 = vector.multi_reduction <add>, %41, %cst_22 [1] : vector<32x128xf32> to vector<32xf32>
    %43 = vector.shape_cast %42 : vector<32xf32> to vector<32x1xf32>
    %cst_23 = arith.constant 7.812500e-03 : f32
    %44 = vector.broadcast %cst_23 : f32 to vector<32x1xf32>
    %45 = arith.mulf %43, %44 : vector<32x1xf32>
    %cst_24 = arith.constant 9.99999974E-6 : f32
    %46 = vector.broadcast %cst_24 : f32 to vector<32x1xf32>
    %47 = arith.addf %45, %46 : vector<32x1xf32>
    %48 = math.rsqrt %47 : vector<32x1xf32>
    %49 = vector.broadcast %48 : vector<32x1xf32> to vector<32x128xf32>
    %50 = arith.mulf %40, %49 : vector<32x128xf32>
    %51 = vector.broadcast %1 : vector<1x128xf32> to vector<32x128xf32>
    %52 = arith.mulf %50, %51 : vector<32x128xf32>
    %53 = vector.broadcast %2 : vector<1x128xf32> to vector<32x128xf32>
    %54 = arith.addf %52, %53 : vector<32x128xf32>
    %55 = arith.truncf %54 : vector<32x128xf32> to vector<32x128xbf16>
    %c0_25 = arith.constant 0 : index
    %c128_26 = arith.constant 128 : index
    %56 = vector.load %arg7[%c0_25, %c128_26] : memref<32x512xbf16, #tpu.memory_space<vmem>>, vector<32x128xbf16>
    tpu.vector_store %arg7[%c0_25, %c128_26], %55 {strides = array<i32>} : memref<32x512xbf16, #tpu.memory_space<vmem>>, vector<32x128xbf16>,
    %c0_27 = arith.constant 0 : index
    %c256 = arith.constant 256 : index
    %57 = vector.load %arg3[%c0_27, %c256] : memref<256x512xbf16, #tpu.memory_space<vmem>>, vector<256x128xbf16>
    %cst_28 = arith.constant dense<0.000000e+00> : vector<32x128xf32>
    %58 = tpu.matmul %0, %57, %cst_28 {dimension_numbers = #tpu.dot_dimension_numbers<[1], [0], [0], [1], [0, 0, 1, 1], [], []>} : vector<32x256xbf16>, vector<256x128xbf16>, vector<32x128xf32> -> vector<32x128xf32>
    %c0_29 = arith.constant 0 : index
    %c256_30 = arith.constant 256 : index
    %59 = vector.load %arg4[%c0_29, %c256_30] : memref<1x512xf32, #tpu.memory_space<vmem>>, vector<1x128xf32>
    %60 = vector.broadcast %59 : vector<1x128xf32> to vector<32x128xf32>
    %61 = arith.addf %58, %60 : vector<32x128xf32>
    %cst_31 = arith.constant dense<0.000000e+00> : vector<32xf32>
    %62 = vector.multi_reduction <add>, %61, %cst_31 [1] : vector<32x128xf32> to vector<32xf32>
    %63 = vector.shape_cast %62 : vector<32xf32> to vector<32x1xf32>
    %cst_32 = arith.constant 7.812500e-03 : f32
    %64 = vector.broadcast %cst_32 : f32 to vector<32x1xf32>
    %65 = arith.mulf %63, %64 : vector<32x1xf32>
    %66 = vector.broadcast %65 : vector<32x1xf32> to vector<32x128xf32>
    %67 = arith.subf %61, %66 : vector<32x128xf32>
    %68 = arith.mulf %67, %67 : vector<32x128xf32>
    %cst_33 = arith.constant dense<0.000000e+00> : vector<32xf32>
    %69 = vector.multi_reduction <add>, %68, %cst_33 [1] : vector<32x128xf32> to vector<32xf32>
    %70 = vector.shape_cast %69 : vector<32xf32> to vector<32x1xf32>
    %cst_34 = arith.constant 7.812500e-03 : f32
    %71 = vector.broadcast %cst_34 : f32 to vector<32x1xf32>
    %72 = arith.mulf %70, %71 : vector<32x1xf32>
    %cst_35 = arith.constant 9.99999974E-6 : f32
    %73 = vector.broadcast %cst_35 : f32 to vector<32x1xf32>
    %74 = arith.addf %72, %73 : vector<32x1xf32>
    %75 = math.rsqrt %74 : vector<32x1xf32>
    %76 = vector.broadcast %75 : vector<32x1xf32> to vector<32x128xf32>
    %77 = arith.mulf %67, %76 : vector<32x128xf32>
    %78 = vector.broadcast %1 : vector<1x128xf32> to vector<32x128xf32>
    %79 = arith.mulf %77, %78 : vector<32x128xf32>
    %80 = vector.broadcast %2 : vector<1x128xf32> to vector<32x128xf32>
    %81 = arith.addf %79, %80 : vector<32x128xf32>
    %82 = arith.truncf %81 : vector<32x128xf32> to vector<32x128xbf16>
    %c0_36 = arith.constant 0 : index
    %c256_37 = arith.constant 256 : index
    %83 = vector.load %arg7[%c0_36, %c256_37] : memref<32x512xbf16, #tpu.memory_space<vmem>>, vector<32x128xbf16>
    tpu.vector_store %arg7[%c0_36, %c256_37], %82 {strides = array<i32>} : memref<32x512xbf16, #tpu.memory_space<vmem>>, vector<32x128xbf16>,
    %c0_38 = arith.constant 0 : index
    %c384 = arith.constant 384 : index
    %84 = vector.load %arg3[%c0_38, %c384] : memref<256x512xbf16, #tpu.memory_space<vmem>>, vector<256x128xbf16>
    %cst_39 = arith.constant dense<0.000000e+00> : vector<32x128xf32>
    %85 = tpu.matmul %0, %84, %cst_39 {dimension_numbers = #tpu.dot_dimension_numbers<[1], [0], [0], [1], [0, 0, 1, 1], [], []>} : vector<32x256xbf16>, vector<256x128xbf16>, vector<32x128xf32> -> vector<32x128xf32>
    %c0_40 = arith.constant 0 : index
    %c384_41 = arith.constant 384 : index
    %86 = vector.load %arg4[%c0_40, %c384_41] : memref<1x512xf32, #tpu.memory_space<vmem>>, vector<1x128xf32>
    %87 = vector.broadcast %86 : vector<1x128xf32> to vector<32x128xf32>
    %88 = arith.addf %85, %87 : vector<32x128xf32>
    %cst_42 = arith.constant dense<0.000000e+00> : vector<32xf32>
    %89 = vector.multi_reduction <add>, %88, %cst_42 [1] : vector<32x128xf32> to vector<32xf32>
    %90 = vector.shape_cast %89 : vector<32xf32> to vector<32x1xf32>
    %cst_43 = arith.constant 7.812500e-03 : f32
    %91 = vector.broadcast %cst_43 : f32 to vector<32x1xf32>
    %92 = arith.mulf %90, %91 : vector<32x1xf32>
    %93 = vector.broadcast %92 : vector<32x1xf32> to vector<32x128xf32>
    %94 = arith.subf %88, %93 : vector<32x128xf32>
    %95 = arith.mulf %94, %94 : vector<32x128xf32>
    %cst_44 = arith.constant dense<0.000000e+00> : vector<32xf32>
    %96 = vector.multi_reduction <add>, %95, %cst_44 [1] : vector<32x128xf32> to vector<32xf32>
    %97 = vector.shape_cast %96 : vector<32xf32> to vector<32x1xf32>
    %cst_45 = arith.constant 7.812500e-03 : f32
    %98 = vector.broadcast %cst_45 : f32 to vector<32x1xf32>
    %99 = arith.mulf %97, %98 : vector<32x1xf32>
    %cst_46 = arith.constant 9.99999974E-6 : f32
    %100 = vector.broadcast %cst_46 : f32 to vector<32x1xf32>
    %101 = arith.addf %99, %100 : vector<32x1xf32>
    %102 = math.rsqrt %101 : vector<32x1xf32>
    %103 = vector.broadcast %102 : vector<32x1xf32> to vector<32x128xf32>
    %104 = arith.mulf %94, %103 : vector<32x128xf32>
    %105 = vector.broadcast %1 : vector<1x128xf32> to vector<32x128xf32>
    %106 = arith.mulf %104, %105 : vector<32x128xf32>
    %107 = vector.broadcast %2 : vector<1x128xf32> to vector<32x128xf32>
    %108 = arith.addf %106, %107 : vector<32x128xf32>
    %109 = arith.truncf %108 : vector<32x128xf32> to vector<32x128xbf16>
    %c0_47 = arith.constant 0 : index
    %c384_48 = arith.constant 384 : index
    %110 = vector.load %arg7[%c0_47, %c384_48] : memref<32x512xbf16, #tpu.memory_space<vmem>>, vector<32x128xbf16>
    tpu.vector_store %arg7[%c0_47, %c384_48], %109 {strides = array<i32>} : memref<32x512xbf16, #tpu.memory_space<vmem>>, vector<32x128xbf16>,
    return
  }
  func.func @transform_0(%arg0: i32, %arg1: i32) -> (i32, i32) {
    %c0_i32 = arith.constant 0 : i32
    %c0_i32_0 = arith.constant 0 : i32
    return %arg0, %c0_i32 : i32, i32
  }
  func.func @transform_1(%arg0: i32, %arg1: i32) -> (i32, i32) {
    %c0_i32 = arith.constant 0 : i32
    %c0_i32_0 = arith.constant 0 : i32
    return %c0_i32, %arg1 : i32, i32
  }
  func.func @transform_2(%arg0: i32, %arg1: i32) -> (i32, i32) {
    %c0_i32 = arith.constant 0 : i32
    %c0_i32_0 = arith.constant 0 : i32
    return %c0_i32, %arg1 : i32, i32
  }
  func.func @transform_3(%arg0: i32, %arg1: i32) -> (i32, i32) {
    %c0_i32 = arith.constant 0 : i32
    %c0_i32_0 = arith.constant 0 : i32
    %c0_i32_1 = arith.constant 0 : i32
    return %c0_i32, %c0_i32_0 : i32, i32
  }
  func.func @transform_4(%arg0: i32, %arg1: i32) -> (i32, i32) {
    %c0_i32 = arith.constant 0 : i32
    %c0_i32_0 = arith.constant 0 : i32
    %c0_i32_1 = arith.constant 0 : i32
    return %c0_i32, %c0_i32_0 : i32, i32
  }
  func.func @transform_5(%arg0: i32, %arg1: i32) -> (i32, i32) {
    %c0_i32 = arith.constant 0 : i32
    return %arg0, %arg1 : i32, i32
  }
}

</mosaic_0001>

<bundles_post_ra>
// kernel: tpu_custom_call.1
= control target key start
LH: loop header
LB: loop body
LE: loop exit
PB: predicated region body
PF: predicated region fallthrough
CT: control target
= control target key end

     0   :  { %10 = vsyncpa [#allocation3], 0  ;;  %s2002_s0 = inlined_call_operand.hbm [shape: bf16[32,256], index: 0, kind: input, shape index: {}]   ;;  %s2003_s1 = inlined_call_operand.hbm [shape: bf16[256,512], index: 1, kind: input, shape index: {}]   ;;  %s2004_s2 = inlined_call_operand.hbm [shape: f32[1,512], index: 2, kind: input, shape index: {}]   ;;  %s2005_s3 = inlined_call_operand.vmem [shape: f32[1,128], index: 3, kind: input, shape index: {}]   ;;  %s2006_s4 = inlined_call_operand.vmem [shape: f32[1,128], index: 4, kind: input, shape index: {}]   ;;  %s2007_s5 = inlined_call_operand.hbm [shape: bf16[32,512], index: 5, kind: output, shape index: {}]  }
   0x1   :  { %11 = vsyncpa [#allocation6], 0  ;;  %s30_s20 = sshll.u32 %s2003_s1, 4  ;;  %s31_s20 = int_to_ptr.hbm [resolvable:$true] %s30_s20 }
   0x2   :  { %12 = vsyncpa [#allocation4], 0  ;;  %s1670_s21 = smov [#allocation5]   ;;  %s17_s25 = sshll.u32 %s2002_s0, 4  ;;  %s18_s25 = int_to_ptr.hbm [resolvable:$true] %s17_s25 }
   0x3   :  { %s32_s22 = sshll.u32 %s1670_s21, 4  ;;  %s1671_s26 = smov 256   ;;  %s33_s22 = int_to_ptr.vmem [resolvable:$true] %s32_s22 }
   0x4   :  { %s1672_s27 = smov 16   ;;  %s1673_s28 = smov [#allocation2]  }
   0x5   :  { %38 = dma.hbm_to_vmem [thread:$0]  %s31_s20, 8192, %s33_s22, [#allocation6], %s1671_s26, %s1671_s26, %s1672_s27  }
   0x6   :  { %s19_s29 = sshll.u32 %s1673_s28, 4  ;;  %s1674_s1 = smov 128   ;;  %s20_s29 = int_to_ptr.vmem [resolvable:$true] %s19_s29 }
   0x7   :  { %s1675_s30 = smov 8   ;;  %s44_s8 = sshll.u32 %s2004_s2, 4  ;;  %s45_s8 = int_to_ptr.hbm [resolvable:$true] %s44_s8 }
   0x8   :  { %25 = dma.hbm_to_vmem [thread:$0]  %s18_s25, 512, %s20_s29, [#allocation3], %s1674_s1, %s1674_s1, %s1675_s30  }
   0x9   :  { %s1676_s9 = smov [#allocation7]  }
   0xa   :  { %s46_s0 = sshll.u32 %s1676_s9, 4  ;;  %s47_s0 = int_to_ptr.vmem [resolvable:$true] %s46_s0 }
   0xb   :  { %49 = dma.hbm_to_vmem [thread:$0]  %s45_s8, 64, %s47_s0, [#allocation6]  }
   0xc   :  { %1664 = dma.done.wait [#allocation3], 512  }
   0xd   :  { %1665 = vsyncadd [#allocation3], 4294966784 }
   0xe   :  { %1666 = dma.done.wait [#allocation6], 8256  }
   0xf   :  { %1667 = vsyncadd [#allocation6], 4294959040  ;;  %v1228_v0 = vld [vmem:[#allocation5 + $0xe0] sm:$0xf]  ;;  %v1465_v1 = vld [vmem:[#allocation5 + $0xec] sm:$0xf0] }
  0x10   :  { %v1260_v2 = vld [vmem:[#allocation5 + $0x1e0] sm:$0xf]  ;;  %v1229_v3 = vor.u32 %v1465_v1, %v1228_v0  ;;  %v1473_v4 = vld [vmem:[#allocation5 + $0x1ec] sm:$0xf0]  ;;  %v1292_v5 = vld [vmem:[#allocation5 + $0xe4] sm:$0xf] }
  0x11   :  { %v1481_v6 = vld [vmem:[#allocation5 + $0xf0] sm:$0xf0]  ;;  %v1261_v7 = vor.u32 %v1473_v4, %v1260_v2  ;;  %v1324_v9 = vld [vmem:[#allocation5 + $0x1e4] sm:$0xf]  ;;  %v1224_v11 = vld [vmem:[#allocation5 + $0xc0] sm:$0xf] }
  0x12   :  { %v1293_v8 = vor.u32 %v1481_v6, %v1292_v5  ;;  %v1489_v10 = vld [vmem:[#allocation5 + $0x1f0] sm:$0xf0]  ;;  %224 = vmatpush.bf16.msra.mxu0 %v1229_v3  ;;  %v1464_v13 = vld [vmem:[#allocation5 + $0xcc] sm:$0xf0]  ;;  %v1256_v14 = vld [vmem:[#allocation5 + $0x1c0] sm:$0xf] }
  0x13   :  { %v1325_v12 = vor.u32 %v1489_v10, %v1324_v9  ;;  %v1472_v15 = vld [vmem:[#allocation5 + $0x1cc] sm:$0xf0]  ;;  %243 = vmatpush.bf16.msra.mxu1 %v1261_v7  ;;  %v1225_v16 = vor.u32 %v1464_v13, %v1224_v11  ;;  %v1288_v18 = vld [vmem:[#allocation5 + $0xc4] sm:$0xf]  ;;  %v1480_v19 = vld [vmem:[#allocation5 + $0xd0] sm:$0xf0] }
  0x14   :  { %496 = vmatpush.bf16.msra.mxu2 %v1293_v8  ;;  %v1257_v17 = vor.u32 %v1472_v15, %v1256_v14  ;;  %v1320_v20 = vld [vmem:[#allocation5 + $0x1c4] sm:$0xf]  ;;  %v1289_v21 = vor.u32 %v1480_v19, %v1288_v18  ;;  %v1488_v22 = vld [vmem:[#allocation5 + $0x1d0] sm:$0xf0]  ;;  %v1220_v23 = vld [vmem:[#allocation5 + $0xa0] sm:$0xf] }
  0x15   :  { %515 = vmatpush.bf16.msra.mxu3 %v1325_v12  ;;  %v1463_v24 = vld [vmem:[#allocation5 + $0xac] sm:$0xf0]  ;;  %v1321_v25 = vor.u32 %v1488_v22, %v1320_v20  ;;  %v1252_v26 = vld [vmem:[#allocation5 + $0x1a0] sm:$0xf]  ;;  %v1284_v28 = vld [vmem:[#allocation5 + $0xa4] sm:$0xf] }
  0x16   :  { %v1471_v27 = vld [vmem:[#allocation5 + $0x1ac] sm:$0xf0]  ;;  %225 = vmatpush.bf16.msra.mxu0 %v1225_v16  ;;  %v1221_v29 = vor.u32 %v1463_v24, %v1220_v23  ;;  %v1479_v30 = vld [vmem:[#allocation5 + $0xb0] sm:$0xf0]  ;;  %v1316_v31 = vld [vmem:[#allocation5 + $0x1a4] sm:$0xf] }
  0x17   :  { %v1487_v32 = vld [vmem:[#allocation5 + $0x1b0] sm:$0xf0]  ;;  %244 = vmatpush.bf16.msra.mxu1 %v1257_v17  ;;  %v1253_v33 = vor.u32 %v1471_v27, %v1252_v26  ;;  %v1285_v34 = vor.u32 %v1479_v30, %v1284_v28  ;;  %v1216_v35 = vld [vmem:[#allocation5 + $0x80] sm:$0xf]  ;;  %v1462_v36 = vld [vmem:[#allocation5 + $0x8c] sm:$0xf0] }
  0x18   :  { %497 = vmatpush.bf16.msra.mxu2 %v1289_v21  ;;  %v1248_v37 = vld [vmem:[#allocation5 + $0x180] sm:$0xf]  ;;  %v1317_v38 = vor.u32 %v1487_v32, %v1316_v31  ;;  %v1470_v39 = vld [vmem:[#allocation5 + $0x18c] sm:$0xf0]  ;;  %v1280_v40 = vld [vmem:[#allocation5 + $0x84] sm:$0xf]  ;;  %v1217_v44 = vor.u32 %v1462_v36, %v1216_v35 }
  0x19   :  { %516 = vmatpush.bf16.msra.mxu3 %v1321_v25  ;;  %v1478_v41 = vld [vmem:[#allocation5 + $0x90] sm:$0xf0]  ;;  %v1312_v42 = vld [vmem:[#allocation5 + $0x184] sm:$0xf]  ;;  %v1249_v45 = vor.u32 %v1470_v39, %v1248_v37  ;;  %v1212_v47 = vld [vmem:[#allocation5 + $0x60] sm:$0xf] }
  0x1a   :  { %v1486_v43 = vld [vmem:[#allocation5 + $0x190] sm:$0xf0]  ;;  %226 = vmatpush.bf16.msra.mxu0 %v1221_v29  ;;  %v1281_v46 = vor.u32 %v1478_v41, %v1280_v40  ;;  %v1461_v48 = vld [vmem:[#allocation5 + $0x6c] sm:$0xf0]  ;;  %v1244_v49 = vld [vmem:[#allocation5 + $0x160] sm:$0xf] }
  0x1b   :  { %245 = vmatpush.bf16.msra.mxu1 %v1253_v33  ;;  %v1313_v50 = vor.u32 %v1486_v43, %v1312_v42  ;;  %v1469_v51 = vld [vmem:[#allocation5 + $0x16c] sm:$0xf0]  ;;  %v1276_v52 = vld [vmem:[#allocation5 + $0x64] sm:$0xf]  ;;  %v1477_v53 = vld [vmem:[#allocation5 + $0x70] sm:$0xf0]  ;;  %v1213_v56 = vor.u32 %v1461_v48, %v1212_v47 }
  0x1c   :  { %498 = vmatpush.bf16.msra.mxu2 %v1285_v34  ;;  %v1308_v54 = vld [vmem:[#allocation5 + $0x164] sm:$0xf]  ;;  %v1485_v55 = vld [vmem:[#allocation5 + $0x170] sm:$0xf0]  ;;  %v1245_v57 = vor.u32 %v1469_v51, %v1244_v49  ;;  %v1277_v58 = vor.u32 %v1477_v53, %v1276_v52  ;;  %v1208_v59 = vld [vmem:[#allocation5 + $0x40] sm:$0xf] }
  0x1d   :  { %517 = vmatpush.bf16.msra.mxu3 %v1317_v38  ;;  %v1460_v60 = vld [vmem:[#allocation5 + $0x4c] sm:$0xf0]  ;;  %v1240_v61 = vld [vmem:[#allocation5 + $0x140] sm:$0xf]  ;;  %v1309_v62 = vor.u32 %v1485_v55, %v1308_v54  ;;  %v1272_v0 = vld [vmem:[#allocation5 + $0x44] sm:$0xf] }
  0x1e   :  { %227 = vmatpush.bf16.msra.mxu0 %v1217_v44  ;;  %v1468_v63 = vld [vmem:[#allocation5 + $0x14c] sm:$0xf0]  ;;  %v1476_v1 = vld [vmem:[#allocation5 + $0x50] sm:$0xf0]  ;;  %v1304_v2 = vld [vmem:[#allocation5 + $0x144] sm:$0xf]  ;;  %v1209_v4 = vor.u32 %v1460_v60, %v1208_v59 }
  0x1f   :  { %246 = vmatpush.bf16.msra.mxu1 %v1249_v45  ;;  %v1484_v3 = vld [vmem:[#allocation5 + $0x150] sm:$0xf0]  ;;  %v1241_v5 = vor.u32 %v1468_v63, %v1240_v61  ;;  %v1273_v6 = vor.u32 %v1476_v1, %v1272_v0  ;;  %v1204_v7 = vld [vmem:[#allocation5 + $0x20] sm:$0xf]  ;;  %v1459_v8 = vld [vmem:[#allocation5 + $0x2c] sm:$0xf0] }
  0x20   :  { %499 = vmatpush.bf16.msra.mxu2 %v1281_v46  ;;  %v1236_v9 = vld [vmem:[#allocation5 + $0x120] sm:$0xf]  ;;  %v1305_v10 = vor.u32 %v1484_v3, %v1304_v2  ;;  %v1467_v11 = vld [vmem:[#allocation5 + $0x12c] sm:$0xf0]  ;;  %v1268_v12 = vld [vmem:[#allocation5 + $0x24] sm:$0xf]  ;;  %v1205_v16 = vor.u32 %v1459_v8, %v1204_v7 }
  0x21   :  { %518 = vmatpush.bf16.msra.mxu3 %v1313_v50  ;;  %v1475_v13 = vld [vmem:[#allocation5 + $0x30] sm:$0xf0]  ;;  %v1300_v14 = vld [vmem:[#allocation5 + $0x124] sm:$0xf]  ;;  %v1200_v17 = vld [vmem:[#allocation5] sm:$0xf]  ;;  %v1237_v19 = vor.u32 %v1467_v11, %v1236_v9 }
  0x22   :  { %228 = vmatpush.bf16.msra.mxu0 %v1213_v56  ;;  %v1483_v15 = vld [vmem:[#allocation5 + $0x130] sm:$0xf0]  ;;  %v1458_v18 = vld [vmem:[#allocation5 + $0xc] sm:$0xf0]  ;;  %v1269_v20 = vor.u32 %v1475_v13, %v1268_v12  ;;  %v1232_v21 = vld [vmem:[#allocation5 + $0x100] sm:$0xf] }
  0x23   :  { %247 = vmatpush.bf16.msra.mxu1 %v1245_v57  ;;  %v1466_v22 = vld [vmem:[#allocation5 + $0x10c] sm:$0xf0]  ;;  %v1264_v23 = vld [vmem:[#allocation5 + $0x4] sm:$0xf]  ;;  %v1301_v24 = vor.u32 %v1483_v15, %v1300_v14  ;;  %v1474_v25 = vld [vmem:[#allocation5 + $0x10] sm:$0xf0]  ;;  %v1201_v31 = vor.u32 %v1458_v18, %v1200_v17 }
  0x24   :  { %500 = vmatpush.bf16.msra.mxu2 %v1277_v58  ;;  %v1296_v26 = vld [vmem:[#allocation5 + $0x104] sm:$0xf]  ;;  %v1482_v27 = vld [vmem:[#allocation5 + $0x110] sm:$0xf0]  ;;  %v1184_v28 = vld [vmem:[#allocation2] sm:$0xf]  ;;  %v1233_v35 = vor.u32 %v1466_v22, %v1232_v21  ;;  %v1265_v36 = vor.u32 %v1474_v25, %v1264_v23 }
  0x25   :  { %519 = vmatpush.bf16.msra.mxu3 %v1309_v62  ;;  %v1356_v29 = vld [vmem:[#allocation5 + $0xe8] sm:$0xf]  ;;  %v1497_v30 = vld [vmem:[#allocation5 + $0xf4] sm:$0xf0]  ;;  %v1454_v37 = vld [vmem:[#allocation2 + $0x4] sm:$0xf]  ;;  %v1297_v39 = vor.u32 %v1482_v27, %v1296_v26 }
  0x26   :  { %229 = vmatpush.bf16.msra.mxu0 %v1209_v4  ;;  %v1455_v32 = vld [vmem:[#allocation2 + $0x4] sm:$0xf0]  ;;  %v1505_v34 = vld [vmem:[#allocation5 + $0x1f4] sm:$0xf0]  ;;  %v1186_v38 = vld [vmem:[#allocation2 + $0x8] sm:$0xf0]  ;;  %v1357_v40 = vor.u32 %v1497_v30, %v1356_v29 }
  0x27   :  { %248 = vmatpush.bf16.msra.mxu1 %v1241_v5  ;;  %v1388_v33 = vld [vmem:[#allocation5 + $0x1e8] sm:$0xf]  ;;  %v1420_v41 = vld [vmem:[#allocation5 + $0xec] sm:$0xf]  ;;  %v1513_v42 = vld [vmem:[#allocation5 + $0xf8] sm:$0xf0]  ;;  %v1720_v44 = vor.u32 %v1455_v32, %v1184_v28  ;;  %v1722_v49 = vor.u32 %v1454_v37, %v1186_v38 }
  0x28   :  { %501 = vmatpush.bf16.msra.mxu2 %v1273_v6  ;;  %v1452_v43 = vld [vmem:[#allocation5 + $0x1ec] sm:$0xf]  ;;  %v1389_v45 = vor.u32 %v1505_v34, %v1388_v33  ;;  %v1521_v46 = vld [vmem:[#allocation5 + $0x1f8] sm:$0xf0]  ;;  %v1352_v47 = vld [vmem:[#allocation5 + $0xc8] sm:$0xf]  ;;  %v1421_v52 = vor.u32 %v1513_v42, %v1420_v41 }
  0x29   :  { %520 = vmatpush.bf16.msra.mxu3 %v1305_v10  ;;  %v1496_v48 = vld [vmem:[#allocation5 + $0xd4] sm:$0xf0]  ;;  %v1384_v50 = vld [vmem:[#allocation5 + $0x1c8] sm:$0xf]  ;;  %v1453_v53 = vor.u32 %v1521_v46, %v1452_v43  ;;  %v1416_v55 = vld [vmem:[#allocation5 + $0xcc] sm:$0xf] }
  0x2a   :  { %230 = vmatpush.bf16.msra.mxu0 %v1205_v16  ;;  %v1504_v51 = vld [vmem:[#allocation5 + $0x1d4] sm:$0xf0]  ;;  %v1353_v54 = vor.u32 %v1496_v48, %v1352_v47  ;;  %v1512_v56 = vld [vmem:[#allocation5 + $0xd8] sm:$0xf0]  ;;  %v1448_v57 = vld [vmem:[#allocation5 + $0x1cc] sm:$0xf] }
  0x2b   :  { %249 = vmatpush.bf16.msra.mxu1 %v1237_v19  ;;  %v1385_v58 = vor.u32 %v1504_v51, %v1384_v50  ;;  %v1520_v59 = vld [vmem:[#allocation5 + $0x1d8] sm:$0xf0]  ;;  %v1348_v60 = vld [vmem:[#allocation5 + $0xa8] sm:$0xf]  ;;  %v1495_v61 = vld [vmem:[#allocation5 + $0xb4] sm:$0xf0]  ;;  %v1417_v0 = vor.u32 %v1512_v56, %v1416_v55 }
  0x2c   :  { %502 = vmatpush.bf16.msra.mxu2 %v1269_v20  ;;  %v1380_v62 = vld [vmem:[#allocation5 + $0x1a8] sm:$0xf]  ;;  %v1503_v63 = vld [vmem:[#allocation5 + $0x1b4] sm:$0xf0]  ;;  %v1449_v1 = vor.u32 %v1520_v59, %v1448_v57  ;;  %v1349_v2 = vor.u32 %v1495_v61, %v1348_v60  ;;  %v1412_v3 = vld [vmem:[#allocation5 + $0xac] sm:$0xf] }
  0x2d   :  { %521 = vmatpush.bf16.msra.mxu3 %v1301_v24  ;;  %v1511_v4 = vld [vmem:[#allocation5 + $0xb8] sm:$0xf0]  ;;  %v1444_v5 = vld [vmem:[#allocation5 + $0x1ac] sm:$0xf]  ;;  %v1381_v6 = vor.u32 %v1503_v63, %v1380_v62  ;;  %v1344_v8 = vld [vmem:[#allocation5 + $0x88] sm:$0xf] }
  0x2e   :  { %231 = vmatpush.bf16.msra.mxu0 %v1201_v31  ;;  %v1519_v7 = vld [vmem:[#allocation5 + $0x1b8] sm:$0xf0]  ;;  %v1494_v9 = vld [vmem:[#allocation5 + $0x94] sm:$0xf0]  ;;  %v1376_v10 = vld [vmem:[#allocation5 + $0x188] sm:$0xf]  ;;  %v1413_v12 = vor.u32 %v1511_v4, %v1412_v3 }
  0x2f   :  { %250 = vmatpush.bf16.msra.mxu1 %v1233_v35  ;;  %v1502_v11 = vld [vmem:[#allocation5 + $0x194] sm:$0xf0]  ;;  %v1408_v13 = vld [vmem:[#allocation5 + $0x8c] sm:$0xf]  ;;  %v1510_v14 = vld [vmem:[#allocation5 + $0x98] sm:$0xf0]  ;;  %v1445_v16 = vor.u32 %v1519_v7, %v1444_v5  ;;  %v1345_v17 = vor.u32 %v1494_v9, %v1344_v8 }
  0x30   :  { %503 = vmatpush.bf16.msra.mxu2 %v1265_v36  ;;  %v1440_v15 = vld [vmem:[#allocation5 + $0x18c] sm:$0xf]  ;;  %v1518_v18 = vld [vmem:[#allocation5 + $0x198] sm:$0xf0]  ;;  %v1192_v19 = vld [vmem:[#allocation2 + $0x10] sm:$0xf]  ;;  %v1377_v21 = vor.u32 %v1502_v11, %v1376_v10  ;;  %v1409_v30 = vor.u32 %v1510_v14, %v1408_v13 }
  0x31   :  { %522 = vmatpush.bf16.msra.mxu3 %v1297_v39  ;;  %232 = vmatmul.bf16.vlgmr.msra.gmra.mxu0 %v1720_v44  ;;  %v1457_v20 = vld [vmem:[#allocation2 + $0x14] sm:$0xf0]  ;;  %v1456_v22 = vld [vmem:[#allocation2 + $0x14] sm:$0xf]  ;;  %v1194_v23 = vld [vmem:[#allocation2 + $0x18] sm:$0xf0]  ;;  %v1441_v34 = vor.u32 %v1518_v18, %v1440_v15 }
  0x32   :  { %762 = vmatpush.bf16.msrb.mxu0 %v1357_v40  ;;  %251 = vmatmul.bf16.vlgmr.msra.gmra.mxu1 %v1722_v49  ;;  %v1340_v24 = vld [vmem:[#allocation5 + $0x68] sm:$0xf]  ;;  %v1493_v25 = vld [vmem:[#allocation5 + $0x74] sm:$0xf0]  ;;  %v1404_v28 = vld [vmem:[#allocation5 + $0x6c] sm:$0xf]  ;;  %v1728_v37 = vor.u32 %v1457_v20, %v1192_v19  ;;  %v1730_v39 = vor.u32 %v1456_v22, %v1194_v23 }
  0x33   :  { %781 = vmatpush.bf16.msrb.mxu1 %v1389_v45  ;;  %504 = vmatmul.bf16.vlgmr.msra.gmra.mxu2 %v1720_v44  ;;  %v1372_v26 = vld [vmem:[#allocation5 + $0x168] sm:$0xf]  ;;  %v1501_v27 = vld [vmem:[#allocation5 + $0x174] sm:$0xf0]  ;;  %v1509_v29 = vld [vmem:[#allocation5 + $0x78] sm:$0xf0]  ;;  %v1341_v35 = vor.u32 %v1493_v25, %v1340_v24 }
  0x34   :  { %523 = vmatmul.bf16.vlgmr.msra.gmra.mxu3 %v1722_v49  ;;  %1028 = vmatpush.bf16.msrb.mxu2 %v1421_v52  ;;  %v1436_v31 = vld [vmem:[#allocation5 + $0x16c] sm:$0xf]  ;;  %v1517_v32 = vld [vmem:[#allocation5 + $0x178] sm:$0xf0]  ;;  %v1336_v33 = vld [vmem:[#allocation5 + $0x48] sm:$0xf]  ;;  %v1373_v38 = vor.u32 %v1501_v27, %v1372_v26  ;;  %v1405_v42 = vor.u32 %v1509_v29, %v1404_v28 }
  0x35   :  { %1047 = vmatpush.bf16.msrb.mxu3 %v1453_v53  ;;  %v1492_v36 = vld [vmem:[#allocation5 + $0x54] sm:$0xf0]  ;;  %v1368_v40 = vld [vmem:[#allocation5 + $0x148] sm:$0xf]  ;;  %v1437_v43 = vor.u32 %v1517_v32, %v1436_v31  ;;  %v1400_v46 = vld [vmem:[#allocation5 + $0x4c] sm:$0xf] }
  0x36   :  { %763 = vmatpush.bf16.msrb.mxu0 %v1353_v54  ;;  %v1500_v41 = vld [vmem:[#allocation5 + $0x154] sm:$0xf0]  ;;  %v1337_v45 = vor.u32 %v1492_v36, %v1336_v33  ;;  %v1508_v47 = vld [vmem:[#allocation5 + $0x58] sm:$0xf0]  ;;  %v1432_v48 = vld [vmem:[#allocation5 + $0x14c] sm:$0xf] }
  0x37   :  { %782 = vmatpush.bf16.msrb.mxu1 %v1385_v58  ;;  %v1369_v50 = vor.u32 %v1500_v41, %v1368_v40  ;;  %v1516_v51 = vld [vmem:[#allocation5 + $0x158] sm:$0xf0]  ;;  %v1332_v52 = vld [vmem:[#allocation5 + $0x28] sm:$0xf]  ;;  %v1491_v53 = vld [vmem:[#allocation5 + $0x34] sm:$0xf0]  ;;  %v1401_v56 = vor.u32 %v1508_v47, %v1400_v46 }
  0x38   :  { %1029 = vmatpush.bf16.msrb.mxu2 %v1417_v0  ;;  %v1364_v54 = vld [vmem:[#allocation5 + $0x128] sm:$0xf]  ;;  %v1499_v55 = vld [vmem:[#allocation5 + $0x134] sm:$0xf0]  ;;  %v1433_v57 = vor.u32 %v1516_v51, %v1432_v48  ;;  %v1333_v58 = vor.u32 %v1491_v53, %v1332_v52  ;;  %v1396_v59 = vld [vmem:[#allocation5 + $0x2c] sm:$0xf] }
  0x39   :  { %1048 = vmatpush.bf16.msrb.mxu3 %v1449_v1  ;;  %v1507_v60 = vld [vmem:[#allocation5 + $0x38] sm:$0xf0]  ;;  %v1428_v61 = vld [vmem:[#allocation5 + $0x12c] sm:$0xf]  ;;  %v1365_v62 = vor.u32 %v1499_v55, %v1364_v54  ;;  %v1328_v0 = vld [vmem:[#allocation5 + $0x8] sm:$0xf] }
  0x3a   :  { %764 = vmatpush.bf16.msrb.mxu0 %v1349_v2  ;;  %v1515_v63 = vld [vmem:[#allocation5 + $0x138] sm:$0xf0]  ;;  %v1490_v1 = vld [vmem:[#allocation5 + $0x14] sm:$0xf0]  ;;  %v1360_v2 = vld [vmem:[#allocation5 + $0x108] sm:$0xf]  ;;  %v1397_v4 = vor.u32 %v1507_v60, %v1396_v59 }
  0x3b   :  { %783 = vmatpush.bf16.msrb.mxu1 %v1381_v6  ;;  %v1498_v3 = vld [vmem:[#allocation5 + $0x114] sm:$0xf0]  ;;  %v1429_v5 = vor.u32 %v1515_v63, %v1428_v61  ;;  %v1329_v6 = vor.u32 %v1490_v1, %v1328_v0  ;;  %v1392_v7 = vld [vmem:[#allocation5 + $0xc] sm:$0xf]  ;;  %v1506_v8 = vld [vmem:[#allocation5 + $0x18] sm:$0xf0] }
  0x3c   :  { %1030 = vmatpush.bf16.msrb.mxu2 %v1413_v12  ;;  %v1361_v9 = vor.u32 %v1498_v3, %v1360_v2  ;;  %v1424_v10 = vld [vmem:[#allocation5 + $0x10c] sm:$0xf]  ;;  %v1514_v11 = vld [vmem:[#allocation5 + $0x118] sm:$0xf0]  ;;  %v1393_v12 = vor.u32 %v1506_v8, %v1392_v7  ;;  %v1530_v14 = vld [vmem:[#allocation7] ss:$0 sm:$0xff] }
  0x3d   :  { %1049 = vmatpush.bf16.msrb.mxu3 %v1445_v16  ;;  %v1425_v13 = vor.u32 %v1514_v11, %v1424_v10  ;;  %v1531_v19 = vld [vmem:[#allocation7 + $0x1] ss:$0 sm:$0xff]  ;;  %v1533_v53 = vld [vmem:[#allocation7 + $0x3] ss:$0 sm:$0xff]  ;;  %s1168_s15 = sshll.u32 %s2007_s5, 4  ;;  %s1169_s15 = int_to_ptr.hbm [resolvable:$true] %s1168_s15 }
  0x3e   :  { %765 = vmatpush.bf16.msrb.mxu0 %v1345_v17 }
  0x3f   :  { %784 = vmatpush.bf16.msrb.mxu1 %v1377_v21 }
  0x40   :  { %1031 = vmatpush.bf16.msrb.mxu2 %v1409_v30 }
  0x41   :  { %1050 = vmatpush.bf16.msrb.mxu3 %v1441_v34  ;;  %237 = vmatmul.bf16.gmra.mxu0 %v1728_v37 }
  0x42   :  { %766 = vmatpush.bf16.msrb.mxu0 %v1341_v35  ;;  %256 = vmatmul.bf16.gmra.mxu1 %v1730_v39 }
  0x43   :  { %785 = vmatpush.bf16.msrb.mxu1 %v1373_v38  ;;  %509 = vmatmul.bf16.gmra.mxu2 %v1728_v37 }
  0x44   :  { %528 = vmatmul.bf16.gmra.mxu3 %v1730_v39  ;;  %1032 = vmatpush.bf16.msrb.mxu2 %v1405_v42  ;;  %v1532_v42 = vld [vmem:[#allocation7 + $0x2] ss:$0 sm:$0xff] }
  0x45   :  { %1051 = vmatpush.bf16.msrb.mxu3 %v1437_v43 }
  0x46   :  { %767 = vmatpush.bf16.msrb.mxu0 %v1337_v45 }
  0x47   :  { %786 = vmatpush.bf16.msrb.mxu1 %v1369_v50 }
  0x48   :  { %1033 = vmatpush.bf16.msrb.mxu2 %v1401_v56 }
  0x49   :  { %1052 = vmatpush.bf16.msrb.mxu3 %v1433_v57 }
  0x4a   :  { %768 = vmatpush.bf16.msrb.mxu0 %v1333_v58 }
  0x4b   :  { %787 = vmatpush.bf16.msrb.mxu1 %v1365_v62 }
  0x4c   :  { %1034 = vmatpush.bf16.msrb.mxu2 %v1397_v4 }
  0x4d   :  { %1053 = vmatpush.bf16.msrb.mxu3 %v1429_v5 }
  0x4e   :  { %769 = vmatpush.bf16.msrb.mxu0 %v1329_v6 }
  0x4f   :  { %788 = vmatpush.bf16.msrb.mxu1 %v1361_v9 }
  0x50   :  { %1035 = vmatpush.bf16.msrb.mxu2 %v1393_v12 }
  0x51   :  { %1054 = vmatpush.bf16.msrb.mxu3 %v1425_v13  ;;  %770 = vmatmul.bf16.vlgmr.msrb.gmra.mxu0 %v1720_v44 }
  0x52   :  { %789 = vmatmul.bf16.vlgmr.msrb.gmra.mxu1 %v1722_v49 }
  0x53   :  { %1036 = vmatmul.bf16.vlgmr.msrb.gmra.mxu2 %v1720_v44 }
  0x54   :  { %1055 = vmatmul.bf16.vlgmr.msrb.gmra.mxu3 %v1722_v49 }
  0x61   :  { %775 = vmatmul.bf16.gmra.mxu0 %v1728_v37 }
  0x62   :  { %794 = vmatmul.bf16.gmra.mxu1 %v1730_v39 }
  0x63   :  { %1041 = vmatmul.bf16.gmra.mxu2 %v1728_v37 }
  0x64   :  { %1060 = vmatmul.bf16.gmra.mxu3 %v1730_v39 }
  0xae   :  { %v233_v15 = vpop.f32.mrf.mxu0 }
  0xaf   :  { %v234_v16 = vadd.f32 %v1530_v14, %v233_v15  ;;  %v252_v17 = vpop.f32.mrf.mxu1 }
  0xb1   :  { %v1744_v18 = vadd.f32 %v252_v17, %v234_v16 }
  0xb3   :  { %262 = vadd.xlane.f32.xlu0 %v1744_v18 }
  0xb6   :  { %v505_v44 = vpop.f32.mrf.mxu2  ;;  %v235_v21 = vpop.f32.mrf.mxu0 }
  0xb7   :  { %v506_v20 = vadd.f32 %v1531_v19, %v505_v44  ;;  %v524_v49 = vpop.f32.mrf.mxu3  ;;  %v236_v22 = vadd.f32 %v1530_v14, %v235_v21  ;;  %v254_v23 = vpop.f32.mrf.mxu1 }
  0xb9   :  { %v1747_v24 = vadd.f32 %v524_v49, %v506_v20  ;;  %v1749_v25 = vadd.f32 %v254_v23, %v236_v22 }
  0xbb   :  { %534 = vadd.xlane.f32.xlu2 %v1747_v24  ;;  %264 = vadd.xlane.f32.xlu0 %v1749_v25 }
  0xbe   :  { %v507_v26 = vpop.f32.mrf.mxu2  ;;  %v238_v29 = vpop.f32.mrf.mxu0 }
  0xbf   :  { %v508_v27 = vadd.f32 %v1531_v19, %v507_v26  ;;  %v526_v28 = vpop.f32.mrf.mxu3  ;;  %v239_v30 = vadd.f32 %v1530_v14, %v238_v29  ;;  %v257_v31 = vpop.f32.mrf.mxu1 }
  0xc1   :  { %v1753_v32 = vadd.f32 %v526_v28, %v508_v27  ;;  %v1755_v33 = vadd.f32 %v257_v31, %v239_v30 }
  0xc3   :  { %536 = vadd.xlane.f32.xlu2 %v1753_v32  ;;  %266 = vadd.xlane.f32.xlu1 %v1755_v33 }
  0xc6   :  { %v510_v34 = vpop.f32.mrf.mxu2  ;;  %v240_v37 = vpop.f32.mrf.mxu0 }
  0xc7   :  { %v511_v35 = vadd.f32 %v1531_v19, %v510_v34  ;;  %v529_v36 = vpop.f32.mrf.mxu3  ;;  %v241_v38 = vadd.f32 %v1530_v14, %v240_v37  ;;  %v259_v39 = vpop.f32.mrf.mxu1 }
  0xc9   :  { %v1759_v40 = vadd.f32 %v529_v36, %v511_v35  ;;  %v1761_v41 = vadd.f32 %v259_v39, %v241_v38 }
  0xcb   :  { %538 = vadd.xlane.f32.xlu0 %v1759_v40  ;;  %268 = vadd.xlane.f32.xlu1 %v1761_v41 }
  0xce   :  { %v512_v43 = vpop.f32.mrf.mxu2  ;;  %v771_v47 = vpop.f32.mrf.mxu0 }
  0xcf   :  { %v513_v45 = vadd.f32 %v1531_v19, %v512_v43  ;;  %v531_v46 = vpop.f32.mrf.mxu3  ;;  %v772_v48 = vadd.f32 %v1532_v42, %v771_v47  ;;  %v790_v50 = vpop.f32.mrf.mxu1 }
  0xd1   :  { %v1765_v51 = vadd.f32 %v531_v46, %v513_v45  ;;  %v1767_v52 = vadd.f32 %v790_v50, %v772_v48 }
  0xd3   :  { %800 = vadd.xlane.f32.xlu2 %v1767_v52  ;;  %540 = vadd.xlane.f32.xlu1 %v1765_v51 }
  0xd6   :  { %v1037_v54 = vpop.f32.mrf.mxu2  ;;  %v773_v57 = vpop.f32.mrf.mxu0 }
  0xd7   :  { %v1038_v55 = vadd.f32 %v1533_v53, %v1037_v54  ;;  %v1056_v56 = vpop.f32.mrf.mxu3  ;;  %v792_v58 = vpop.f32.mrf.mxu1  ;;  %v774_v60 = vadd.f32 %v1532_v42, %v773_v57 }
  0xd9   :  { %v1771_v59 = vadd.f32 %v1056_v56, %v1038_v55  ;;  %v1774_v2 = vadd.f32 %v792_v58, %v774_v60 }
  0xdb   :  { %1066 = vadd.xlane.f32.xlu0 %v1771_v59 }
  0xde   :  { %v1039_v61 = vpop.f32.mrf.mxu2  ;;  %v776_v0 = vpop.f32.mrf.mxu0 }
  0xdf   :  { %v1040_v62 = vadd.f32 %v1533_v53, %v1039_v61  ;;  %v1058_v63 = vpop.f32.mrf.mxu3  ;;  %v795_v1 = vpop.f32.mrf.mxu1  ;;  %v777_v4 = vadd.f32 %v1532_v42, %v776_v0 }
  0xe1   :  { %v1776_v3 = vadd.f32 %v1058_v63, %v1040_v62  ;;  %v1780_v9 = vadd.f32 %v795_v1, %v777_v4 }
  0xe3   :  { %1068 = vadd.xlane.f32.xlu1 %v1776_v3  ;;  %802 = vadd.xlane.f32.xlu0 %v1774_v2 }
  0xe6   :  { %v1042_v5 = vpop.f32.mrf.mxu2  ;;  %v778_v7 = vpop.f32.mrf.mxu0 }
  0xe7   :  { %v1061_v6 = vpop.f32.mrf.mxu3  ;;  %v779_v8 = vadd.f32 %v1532_v42, %v778_v7  ;;  %v797_v10 = vpop.f32.mrf.mxu1  ;;  %v1043_v12 = vadd.f32 %v1533_v53, %v1042_v5 }
  0xe9   :  { %v1782_v11 = vadd.f32 %v797_v10, %v779_v8  ;;  %v1788_v17 = vadd.f32 %v1061_v6, %v1043_v12 }
  0xeb   :  { %804 = vadd.xlane.f32.xlu1 %v1780_v9  ;;  %806 = vadd.xlane.f32.xlu2 %v1782_v11 }
  0xee   :  { %v1044_v13 = vpop.f32.mrf.mxu2 }
  0xef   :  { %v1045_v14 = vadd.f32 %v1533_v53, %v1044_v13  ;;  %v1063_v15 = vpop.f32.mrf.mxu3 }
  0xf1   :  { %v1786_v16 = vadd.f32 %v1063_v15, %v1045_v14 }
  0xf3   :  { %1072 = vadd.xlane.f32.xlu0 %v1786_v16  ;;  %1070 = vadd.xlane.f32.xlu2 %v1788_v17 }
 0x126   :  { %v263_v19 = vpop.xlane.xlu0 %262 }
 0x127   :  { %v270_v44 = vmul.f32 0.0078125, %v263_v19 }
 0x129   :  { %v1793_v20 = vsub.f32 %v1744_v18, %v270_v44 }
 0x12b   :  { %v278_v49 = vmul.f32 %v1793_v20, %v1793_v20 }
 0x12d   :  { %282 = vadd.xlane.f32.xlu1 %v278_v49 }
 0x12e   :  { %v535_v21 = vpop.xlane.xlu2 %534  ;;  %v265_v23 = vpop.xlane.xlu0 %264 }
 0x12f   :  { %v542_v22 = vmul.f32 0.0078125, %v535_v21  ;;  %v271_v27 = vmul.f32 0.0078125, %v265_v23 }
 0x131   :  { %v1798_v26 = vsub.f32 %v1747_v24, %v542_v22  ;;  %v1803_v30 = vsub.f32 %v1749_v25, %v271_v27 }
 0x133   :  { %v550_v28 = vmul.f32 %v1798_v26, %v1798_v26  ;;  %v279_v24 = vmul.f32 %v1803_v30, %v1803_v30 }
 0x135   :  { %554 = vadd.xlane.f32.xlu2 %v550_v28 }
 0x136   :  { %v537_v29 = vpop.xlane.xlu2 %536  ;;  %v267_v31 = vpop.xlane.xlu1 %266 }
 0x137   :  { %v543_v18 = vmul.f32 0.0078125, %v537_v29  ;;  %v272_v35 = vmul.f32 0.0078125, %v267_v31 }
 0x139   :  { %v1806_v34 = vsub.f32 %v1753_v32, %v543_v18  ;;  %v1813_v38 = vsub.f32 %v1755_v33, %v272_v35 }
 0x13b   :  { %v551_v36 = vmul.f32 %v1806_v34, %v1806_v34  ;;  %v280_v43 = vmul.f32 %v1813_v38, %v1813_v38 }
 0x13d   :  { %556 = vadd.xlane.f32.xlu0 %v551_v36  ;;  %284 = vadd.xlane.f32.xlu2 %v279_v24 }
 0x13e   :  { %v539_v37 = vpop.xlane.xlu0 %538  ;;  %v269_v39 = vpop.xlane.xlu1 %268 }
 0x13f   :  { %v544_v25 = vmul.f32 0.0078125, %v539_v37  ;;  %v273_v32 = vmul.f32 0.0078125, %v269_v39 }
 0x141   :  { %v1816_v42 = vsub.f32 %v1759_v40, %v544_v25  ;;  %v1823_v46 = vsub.f32 %v1761_v41, %v273_v32 }
 0x143   :  { %v552_v45 = vmul.f32 %v1816_v42, %v1816_v42  ;;  %v281_v54 = vmul.f32 %v1823_v46, %v1823_v46 }
 0x145   :  { %286 = vadd.xlane.f32.xlu0 %v280_v43  ;;  %558 = vadd.xlane.f32.xlu1 %v552_v45 }
 0x146   :  { %v801_v47 = vpop.xlane.xlu2 %800  ;;  %v541_v33 = vpop.xlane.xlu1 %540 }
 0x147   :  { %v808_v48 = vmul.f32 0.0078125, %v801_v47  ;;  %v545_v50 = vmul.f32 0.0078125, %v541_v33  ;;  %v1877_v47 = vld [vmem:[%s2005_s3] ss:$0 sm:$0xff]  ;;  %s1677_s3 = smov [#allocation8]  }
 0x149   :  { %v1826_v53 = vsub.f32 %v1767_v52, %v808_v48  ;;  %v1829_v40 = vsub.f32 %v1765_v51, %v545_v50  ;;  %v1883_v50 = vld [vmem:[%s2006_s4] ss:$0 sm:$0xff]  ;;  %s1166_s4 = sshll.u32 %s1677_s3, 4  ;;  %s1167_s4 = int_to_ptr.vmem [resolvable:$true] %s1166_s4 }
 0x14b   :  { %v816_v55 = vmul.f32 %v1826_v53, %v1826_v53  ;;  %v553_v41 = vmul.f32 %v1829_v40, %v1829_v40 }
 0x14d   :  { %288 = vadd.xlane.f32.xlu1 %v281_v54  ;;  %820 = vadd.xlane.f32.xlu0 %v816_v55 }
 0x14e   :  { %v1067_v56 = vpop.xlane.xlu0 %1066  ;;  %560 = vadd.xlane.f32.xlu2 %v553_v41 }
 0x14f   :  { %v1074_v57 = vmul.f32 0.0078125, %v1067_v56 }
 0x151   :  { %v1838_v52 = vsub.f32 %v1771_v59, %v1074_v57 }
 0x153   :  { %v1082_v51 = vmul.f32 %v1838_v52, %v1838_v52 }
 0x155   :  { %1086 = vadd.xlane.f32.xlu1 %v1082_v51 }
 0x156   :  { %v1069_v58 = vpop.xlane.xlu1 %1068  ;;  %v803_v60 = vpop.xlane.xlu0 %802 }
 0x157   :  { %v809_v61 = vmul.f32 0.0078125, %v803_v60  ;;  %v1075_v7 = vmul.f32 0.0078125, %v1069_v58 }
 0x159   :  { %v1843_v62 = vsub.f32 %v1774_v2, %v809_v61  ;;  %v1858_v12 = vsub.f32 %v1776_v3, %v1075_v7 }
 0x15b   :  { %v817_v63 = vmul.f32 %v1843_v62, %v1843_v62  ;;  %v1083_v19 = vmul.f32 %v1858_v12, %v1858_v12 }
 0x15d   :  { %822 = vadd.xlane.f32.xlu1 %v817_v63 }
 0x15e   :  { %v805_v0 = vpop.xlane.xlu1 %804  ;;  %v807_v4 = vpop.xlane.xlu2 %806 }
 0x15f   :  { %v810_v1 = vmul.f32 0.0078125, %v805_v0  ;;  %v811_v5 = vmul.f32 0.0078125, %v807_v4 }
 0x161   :  { %v1848_v59 = vsub.f32 %v1780_v9, %v810_v1  ;;  %v1851_v6 = vsub.f32 %v1782_v11, %v811_v5 }
 0x163   :  { %v818_v8 = vmul.f32 %v1848_v59, %v1848_v59  ;;  %v819_v2 = vmul.f32 %v1851_v6, %v1851_v6 }
 0x165   :  { %824 = vadd.xlane.f32.xlu2 %v818_v8  ;;  %826 = vadd.xlane.f32.xlu0 %v819_v2 }
 0x166   :  { %v1073_v10 = vpop.xlane.xlu0 %1072  ;;  %v1071_v14 = vpop.xlane.xlu2 %1070 }
 0x167   :  { %v1077_v13 = vmul.f32 0.0078125, %v1073_v10  ;;  %v1076_v9 = vmul.f32 0.0078125, %v1071_v14 }
 0x169   :  { %v1861_v15 = vsub.f32 %v1786_v16, %v1077_v13  ;;  %v1864_v11 = vsub.f32 %v1788_v17, %v1076_v9 }
 0x16b   :  { %v1085_v44 = vmul.f32 %v1861_v15, %v1861_v15  ;;  %v1084_v49 = vmul.f32 %v1864_v11, %v1864_v11 }
 0x16d   :  { %1088 = vadd.xlane.f32.xlu2 %v1083_v19  ;;  %1092 = vadd.xlane.f32.xlu1 %v1085_v44 }
 0x16e   :  { %1090 = vadd.xlane.f32.xlu0 %v1084_v49 }
 0x1a0   :  { %v283_v3 = vpop.xlane.xlu1 %282 }
 0x1a1   :  { %v290_v21 = vmul.f32 0.0078125, %v283_v3 }
 0x1a3   :  { %v294_v22 = vadd.f32 1e-05, %v290_v21 }
 0x1a5   :  { %1536 = vrsqrt.f32 %v294_v22  ;;  %vm304_vm1 = vweird.f32 %v294_v22 }
 0x1a8   :  { %v555_v16 = vpop.xlane.xlu2 %554 }
 0x1a9   :  { %v562_v23 = vmul.f32 0.0078125, %v555_v16 }
 0x1ab   :  { %v566_v17 = vadd.f32 1e-05, %v562_v23  ;;  %v1537_v27 = vpop.eup %1536 }
 0x1ac   :  { %v299_v28 = vmul.f32 %v1537_v27, %v294_v22  ;;  %vm305_vm0 = vweird.f32 %v1537_v27 }
 0x1ad   :  { %1538 = vrsqrt.f32 %v566_v17  ;;  %vm306_vm2 = vmor %vm304_vm1, %vm305_vm0  ;;  %vm576_vm4 = vweird.f32 %v566_v17 }
 0x1ae   :  { %v300_v29 = vmul.f32 %v1537_v27, %v299_v28 }
 0x1b0   :  { %v285_v18 = vpop.xlane.xlu2 %284  ;;  %v557_v31 = vpop.xlane.xlu0 %556  ;;  %v301_v35 = vmul.f32 0.5, %v300_v29 }
 0x1b1   :  { %v291_v36 = vmul.f32 0.0078125, %v285_v18  ;;  %v563_v24 = vmul.f32 0.0078125, %v557_v31 }
 0x1b2   :  { %v302_v25 = vsub.f32 1.5, %v301_v35 }
 0x1b3   :  { %v1539_v37 = vpop.eup %1538  ;;  %v295_v39 = vadd.f32 1e-05, %v291_v36  ;;  %v1872_v32 = vadd.f32 1e-05, %v563_v24 }
 0x1b4   :  { %v571_v43 = vmul.f32 %v1539_v37, %v566_v17  ;;  %v303_v45 = vmul.f32 %v1537_v27, %v302_v25  ;;  %vm577_vm3 = vweird.f32 %v1539_v37 }
 0x1b5   :  { %1540 = vrsqrt.f32 %v295_v39  ;;  %vm578_vm5 = vmor %vm576_vm4, %vm577_vm3  ;;  %vm314_vm6 = vweird.f32 %v295_v39  ;;  %vm586_vm10 = vweird.f32 %v1872_v32 }
 0x1b6   :  { %v572_v33 = vmul.f32 %v1539_v37, %v571_v43  ;;  %1542 = vrsqrt.f32 %v1872_v32  ;;  %v307_v48 = vsel %vm306_vm2, %v1537_v27, %v303_v45 }
 0x1b7   :  { %v338_v54 = vmul.f32 %v307_v48, %v1793_v20 }
 0x1b8   :  { %v573_v55 = vmul.f32 0.5, %v572_v33  ;;  %v559_v41 = vpop.xlane.xlu1 %558  ;;  %v287_v56 = vpop.xlane.xlu0 %286 }
 0x1b9   :  { %v564_v57 = vmul.f32 0.0078125, %v559_v41  ;;  %v292_v51 = vmul.f32 0.0078125, %v287_v56  ;;  %v345_v58 = vmul.f32 %v1877_v47, %v338_v54 }
 0x1ba   :  { %v574_v60 = vsub.f32 1.5, %v573_v55 }
 0x1bb   :  { %v1541_v61 = vpop.eup %1540  ;;  %v1887_v63 = vadd.f32 1e-05, %v564_v57  ;;  %v1889_v0 = vadd.f32 1e-05, %v292_v51  ;;  %v352_v4 = vadd.f32 %v1883_v50, %v345_v58 }
 0x1bc   :  { %v1543_v1 = vpop.eup %1542  ;;  %v575_v5 = vmul.f32 %v1539_v37, %v574_v60  ;;  %v309_v20 = vmul.f32 %v1541_v61, %v295_v39  ;;  %vm315_vm7 = vweird.f32 %v1541_v61 }
 0x1bd   :  { %v581_v7 = vmul.f32 %v1543_v1, %v1872_v32  ;;  %1544 = vrsqrt.f32 %v1887_v63  ;;  %v356_v8 = vpack.c.bf16 %v352_v4, %v352_v4  ;;  %vm587_vm8 = vweird.f32 %v1543_v1  ;;  %vm316_vm9 = vmor %vm314_vm6, %vm315_vm7 }
 0x1be   :  { %v579_v2 = vsel %vm578_vm5, %v1539_v37, %v575_v5  ;;  %v310_v10 = vmul.f32 %v1541_v61, %v309_v20  ;;  %1546 = vrsqrt.f32 %v1889_v0  ;;  %vm588_vm11 = vmor %vm586_vm10, %vm587_vm8  ;;  %vm596_vm14 = vweird.f32 %v1887_v63 }
 0x1bf   :  { %v610_v13 = vmul.f32 %v579_v2, %v1798_v26  ;;  %v582_v14 = vmul.f32 %v1543_v1, %v581_v7  ;;  %360 = vst [vmem:[#allocation8] sm:$0xf] %v356_v8  ;;  %vm324_vm0 = vweird.f32 %v1889_v0 }
 0x1c0   :  { %v311_v9 = vmul.f32 0.5, %v310_v10  ;;  %v289_v19 = vpop.xlane.xlu1 %288  ;;  %v821_v22 = vpop.xlane.xlu0 %820 }
 0x1c1   :  { %v614_v44 = vmul.f32 %v1877_v47, %v610_v13  ;;  %v583_v49 = vmul.f32 0.5, %v582_v14  ;;  %v293_v3 = vmul.f32 0.0078125, %v289_v19  ;;  %v561_v21 = vpop.xlane.xlu2 %560  ;;  %v828_v36 = vmul.f32 0.0078125, %v821_v22 }
 0x1c2   :  { %v312_v16 = vsub.f32 1.5, %v311_v9  ;;  %v565_v23 = vmul.f32 0.0078125, %v561_v21 }
 0x1c3   :  { %v1545_v17 = vpop.eup %1544  ;;  %v618_v27 = vadd.f32 %v1883_v50, %v614_v44  ;;  %v584_v28 = vsub.f32 1.5, %v583_v49  ;;  %v1898_v26 = vadd.f32 1e-05, %v293_v3  ;;  %v1909_v41 = vadd.f32 1e-05, %v828_v36 }
 0x1c4   :  { %v1547_v29 = vpop.eup %1546  ;;  %v313_v18 = vmul.f32 %v1541_v61, %v312_v16  ;;  %v591_v31 = vmul.f32 %v1545_v17, %v1887_v63  ;;  %v1901_v35 = vadd.f32 1e-05, %v565_v23  ;;  %vm597_vm12 = vweird.f32 %v1545_v17 }
 0x1c5   :  { %v622_v24 = vpack.c.bf16 %v618_v27, %v618_v27  ;;  %v585_v37 = vmul.f32 %v1543_v1, %v584_v28  ;;  %v319_v25 = vmul.f32 %v1547_v29, %v1889_v0  ;;  %1548 = vrsqrt.f32 %v1898_v26  ;;  %vm598_vm15 = vmor %vm596_vm14, %vm597_vm12 }
 0x1c6   :  { %v317_v39 = vsel %vm316_vm9, %v1541_v61, %v313_v18  ;;  %v592_v43 = vmul.f32 %v1545_v17, %v591_v31  ;;  %1550 = vrsqrt.f32 %v1901_v35  ;;  %vm325_vm13 = vweird.f32 %v1547_v29 }
 0x1c7   :  { %626 = vst [vmem:[#allocation8 + $0x4] sm:$0xf] %v622_v24  ;;  %v339_v45 = vmul.f32 %v317_v39, %v1803_v30  ;;  %v589_v33 = vsel %vm588_vm11, %v1543_v1, %v585_v37  ;;  %v320_v48 = vmul.f32 %v1547_v29, %v319_v25  ;;  %1552 = vrsqrt.f32 %v1909_v41  ;;  %vm326_vm1 = vmor %vm324_vm0, %vm325_vm13 }
 0x1c8   :  { %v611_v54 = vmul.f32 %v589_v33, %v1806_v34  ;;  %v593_v55 = vmul.f32 0.5, %v592_v43  ;;  %v1087_v32 = vpop.xlane.xlu1 %1086  ;;  %vm334_vm4 = vweird.f32 %v1898_v26  ;;  %vm606_vm6 = vweird.f32 %v1901_v35 }
 0x1c9   :  { %v346_v56 = vmul.f32 %v1877_v47, %v339_v45  ;;  %v321_v57 = vmul.f32 0.5, %v320_v48  ;;  %v1094_v51 = vmul.f32 0.0078125, %v1087_v32  ;;  %vm842_vm9 = vweird.f32 %v1909_v41 }
 0x1ca   :  { %v615_v58 = vmul.f32 %v1877_v47, %v611_v54  ;;  %v594_v60 = vsub.f32 1.5, %v593_v55 }
 0x1cb   :  { %v353_v30 = vadd.f32 %v1883_v50, %v346_v56  ;;  %v322_v61 = vsub.f32 1.5, %v321_v57  ;;  %v1915_v1 = vadd.f32 1e-05, %v1094_v51  ;;  %v1549_v34 = vpop.eup %1548 }
 0x1cc   :  { %v619_v4 = vadd.f32 %v1883_v50, %v615_v58  ;;  %v595_v5 = vmul.f32 %v1545_v17, %v594_v60  ;;  %v1551_v20 = vpop.eup %1550  ;;  %v329_v2 = vmul.f32 %v1549_v34, %v1898_v26  ;;  %vm335_vm2 = vweird.f32 %v1549_v34 }
 0x1cd   :  { %v357_v7 = vpack.c.bf16 %v353_v30, %v353_v30  ;;  %v323_v8 = vmul.f32 %v1547_v29, %v322_v61  ;;  %v601_v14 = vmul.f32 %v1551_v20, %v1901_v35  ;;  %1554 = vrsqrt.f32 %v1915_v1  ;;  %v1553_v63 = vpop.eup %1552  ;;  %vm336_vm5 = vmor %vm334_vm4, %vm335_vm2 }
 0x1ce   :  { %v623_v10 = vpack.c.bf16 %v619_v4, %v619_v4  ;;  %v599_v13 = vsel %vm598_vm15, %v1545_v17, %v595_v5  ;;  %v330_v44 = vmul.f32 %v1549_v34, %v329_v2  ;;  %v837_v16 = vmul.f32 %v1553_v63, %v1909_v41 }
 0x1cf   :  { %361 = vst [vmem:[#allocation8 + $0x10] sm:$0xf] %v357_v7  ;;  %v612_v9 = vmul.f32 %v599_v13, %v1816_v42  ;;  %v327_v19 = vsel %vm326_vm1, %v1547_v29, %v323_v8  ;;  %v602_v3 = vmul.f32 %v1551_v20, %v601_v14  ;;  %vm607_vm3 = vweird.f32 %v1551_v20 }
 0x1d0   :  { %627 = vst [vmem:[#allocation8 + $0x14] sm:$0xf] %v623_v10  ;;  %v340_v49 = vmul.f32 %v327_v19, %v1813_v38  ;;  %v823_v0 = vpop.xlane.xlu1 %822  ;;  %v331_v22 = vmul.f32 0.5, %v330_v44  ;;  %v838_v29 = vmul.f32 %v1553_v63, %v837_v16  ;;  %vm608_vm7 = vmor %vm606_vm6, %vm607_vm3  ;;  %vm843_vm8 = vweird.f32 %v1553_v63 }
 0x1d1   :  { %v616_v21 = vmul.f32 %v1877_v47, %v612_v9  ;;  %v603_v17 = vmul.f32 0.5, %v602_v3  ;;  %v829_v27 = vmul.f32 0.0078125, %v823_v0  ;;  %vm844_vm10 = vmor %vm842_vm9, %vm843_vm8  ;;  %vm1108_vm12 = vweird.f32 %v1915_v1 }
 0x1d2   :  { %v347_v23 = vmul.f32 %v1877_v47, %v340_v49  ;;  %v332_v28 = vsub.f32 1.5, %v331_v22  ;;  %v839_v25 = vmul.f32 0.5, %v838_v29 }
 0x1d3   :  { %v620_v42 = vadd.f32 %v1883_v50, %v616_v21  ;;  %v604_v31 = vsub.f32 1.5, %v603_v17  ;;  %v1930_v38 = vadd.f32 1e-05, %v829_v27  ;;  %v1555_v36 = vpop.eup %1554 }
 0x1d4   :  { %v354_v18 = vadd.f32 %v1883_v50, %v347_v23  ;;  %v333_v37 = vmul.f32 %v1549_v34, %v332_v28  ;;  %v1103_v45 = vmul.f32 %v1555_v36, %v1915_v1  ;;  %v840_v48 = vsub.f32 1.5, %v839_v25 }
 0x1d5   :  { %v624_v24 = vpack.c.bf16 %v620_v42, %v620_v42  ;;  %v605_v43 = vmul.f32 %v1551_v20, %v604_v31  ;;  %1556 = vrsqrt.f32 %v1930_v38  ;;  %vm1109_vm11 = vweird.f32 %v1555_v36 }
 0x1d6   :  { %v358_v39 = vpack.c.bf16 %v354_v18, %v354_v18  ;;  %v337_v33 = vsel %vm336_vm5, %v1549_v34, %v333_v37  ;;  %v1104_v26 = vmul.f32 %v1555_v36, %v1103_v45  ;;  %v841_v57 = vmul.f32 %v1553_v63, %v840_v48  ;;  %vm1110_vm13 = vmor %vm1108_vm12, %vm1109_vm11 }
 0x1d7   :  { %628 = vst [vmem:[#allocation8 + $0x24] sm:$0xf] %v624_v24  ;;  %v341_v54 = vmul.f32 %v337_v33, %v1823_v46  ;;  %v609_v55 = vsel %vm608_vm7, %v1551_v20, %v605_v43  ;;  %vm852_vm15 = vweird.f32 %v1930_v38 }
 0x1d8   :  { %362 = vst [vmem:[#allocation8 + $0x20] sm:$0xf] %v358_v39  ;;  %v825_v32 = vpop.xlane.xlu2 %824  ;;  %v613_v56 = vmul.f32 %v609_v55, %v1829_v40  ;;  %v827_v51 = vpop.xlane.xlu0 %826  ;;  %v1105_v60 = vmul.f32 0.5, %v1104_v26  ;;  %v845_v34 = vsel %vm844_vm10, %v1553_v63, %v841_v57 }
 0x1d9   :  { %v830_v35 = vmul.f32 0.0078125, %v825_v32  ;;  %v348_v58 = vmul.f32 %v1877_v47, %v341_v54  ;;  %v831_v30 = vmul.f32 0.0078125, %v827_v51  ;;  %v876_v40 = vmul.f32 %v845_v34, %v1826_v53 }
 0x1da   :  { %v617_v61 = vmul.f32 %v1877_v47, %v613_v56  ;;  %v1106_v5 = vsub.f32 1.5, %v1105_v60 }
 0x1db   :  { %v1941_v46 = vadd.f32 1e-05, %v830_v35  ;;  %v355_v4 = vadd.f32 %v1883_v50, %v348_v58  ;;  %v1945_v20 = vadd.f32 1e-05, %v831_v30  ;;  %v1557_v41 = vpop.eup %1556  ;;  %v880_v2 = vmul.f32 %v1877_v47, %v876_v40 }
 0x1dc   :  { %v621_v7 = vadd.f32 %v1883_v50, %v617_v61  ;;  %v1107_v10 = vmul.f32 %v1555_v36, %v1106_v5  ;;  %v847_v13 = vmul.f32 %v1557_v41, %v1930_v38  ;;  %vm853_vm14 = vweird.f32 %v1557_v41 }
 0x1dd   :  { %1558 = vrsqrt.f32 %v1941_v46  ;;  %v359_v8 = vpack.c.bf16 %v355_v4, %v355_v4  ;;  %v884_v53 = vadd.f32 %v1883_v50, %v880_v2  ;;  %vm854_vm0 = vmor %vm852_vm15, %vm853_vm14  ;;  %vm862_vm2 = vweird.f32 %v1941_v46 }
 0x1de   :  { %v625_v14 = vpack.c.bf16 %v621_v7, %v621_v7  ;;  %1560 = vrsqrt.f32 %v1945_v20  ;;  %v1111_v9 = vsel %vm1110_vm13, %v1555_v36, %v1107_v10  ;;  %v848_v19 = vmul.f32 %v1557_v41, %v847_v13 }
 0x1df   :  { %363 = vst [vmem:[#allocation8 + $0x30] sm:$0xf] %v359_v8  ;;  %v1142_v63 = vmul.f32 %v1111_v9, %v1838_v52  ;;  %v888_v21 = vpack.c.bf16 %v884_v53, %v884_v53  ;;  %vm872_vm5 = vweird.f32 %v1945_v20 }
 0x1e0   :  { %v1089_v44 = vpop.xlane.xlu2 %1088  ;;  %v1093_v1 = vpop.xlane.xlu1 %1092  ;;  %629 = vst [vmem:[#allocation8 + $0x34] sm:$0xf] %v625_v14  ;;  %v849_v22 = vmul.f32 0.5, %v848_v19 }
 0x1e1   :  { %v1095_v49 = vmul.f32 0.0078125, %v1089_v44  ;;  %v1097_v3 = vmul.f32 0.0078125, %v1093_v1  ;;  %v1091_v0 = vpop.xlane.xlu0 %1090  ;;  %v1146_v17 = vmul.f32 %v1877_v47, %v1142_v63  ;;  %892 = vst [vmem:[#allocation8 + $0x8] sm:$0xf] %v888_v21 }
 0x1e2   :  { %v1096_v16 = vmul.f32 0.0078125, %v1091_v0  ;;  %v850_v28 = vsub.f32 1.5, %v849_v22 }
 0x1e3   :  { %v1559_v23 = vpop.eup %1558  ;;  %v1957_v27 = vadd.f32 1e-05, %v1095_v49  ;;  %v1959_v42 = vadd.f32 1e-05, %v1097_v3  ;;  %v1150_v31 = vadd.f32 %v1883_v50, %v1146_v17 }
 0x1e4   :  { %v857_v29 = vmul.f32 %v1559_v23, %v1941_v46  ;;  %v1962_v18 = vadd.f32 1e-05, %v1096_v16  ;;  %v1561_v52 = vpop.eup %1560  ;;  %v851_v36 = vmul.f32 %v1557_v41, %v850_v28  ;;  %vm863_vm1 = vweird.f32 %v1559_v23 }
 0x1e5   :  { %1562 = vrsqrt.f32 %v1957_v27  ;;  %v867_v37 = vmul.f32 %v1561_v52, %v1945_v20  ;;  %v1154_v25 = vpack.c.bf16 %v1150_v31, %v1150_v31  ;;  %vm873_vm3 = vweird.f32 %v1561_v52  ;;  %vm864_vm4 = vmor %vm862_vm2, %vm863_vm1 }
 0x1e6   :  { %v858_v24 = vmul.f32 %v1559_v23, %v857_v29  ;;  %1564 = vrsqrt.f32 %v1959_v42  ;;  %v855_v39 = vsel %vm854_vm0, %v1557_v41, %v851_v36  ;;  %vm874_vm6 = vmor %vm872_vm5, %vm873_vm3  ;;  %vm1118_vm8 = vweird.f32 %v1957_v27 }
 0x1e7   :  { %v868_v45 = vmul.f32 %v1561_v52, %v867_v37  ;;  %1566 = vrsqrt.f32 %v1962_v18  ;;  %1158 = vst [vmem:[#allocation8 + $0xc] sm:$0xf] %v1154_v25  ;;  %v877_v33 = vmul.f32 %v855_v39, %v1843_v62  ;;  %vm1138_vm12 = vweird.f32 %v1959_v42 }
 0x1e8   :  { %v859_v43 = vmul.f32 0.5, %v858_v24  ;;  %vm1128_vm14 = vweird.f32 %v1962_v18 }
 0x1e9   :  { %v869_v54 = vmul.f32 0.5, %v868_v45  ;;  %v881_v38 = vmul.f32 %v1877_v47, %v877_v33 }
 0x1ea   :  { %v860_v48 = vsub.f32 1.5, %v859_v43 }
 0x1eb   :  { %v1563_v55 = vpop.eup %1562  ;;  %v870_v32 = vsub.f32 1.5, %v869_v54  ;;  %v885_v35 = vadd.f32 %v1883_v50, %v881_v38 }
 0x1ec   :  { %v861_v26 = vmul.f32 %v1559_v23, %v860_v48  ;;  %v1113_v56 = vmul.f32 %v1563_v55, %v1957_v27  ;;  %v1565_v57 = vpop.eup %1564  ;;  %vm1119_vm7 = vweird.f32 %v1563_v55 }
 0x1ed   :  { %v1567_v62 = vpop.eup %1566  ;;  %v871_v58 = vmul.f32 %v1561_v52, %v870_v32  ;;  %v1133_v30 = vmul.f32 %v1565_v57, %v1959_v42  ;;  %v889_v61 = vpack.c.bf16 %v885_v35, %v885_v35  ;;  %vm1139_vm9 = vweird.f32 %v1565_v57  ;;  %vm1120_vm10 = vmor %vm1118_vm8, %vm1119_vm7 }
 0x1ee   :  { %v865_v51 = vsel %vm864_vm4, %v1559_v23, %v861_v26  ;;  %v1114_v60 = vmul.f32 %v1563_v55, %v1113_v56  ;;  %v1123_v46 = vmul.f32 %v1567_v62, %v1962_v18  ;;  %vm1129_vm11 = vweird.f32 %v1567_v62  ;;  %vm1140_vm13 = vmor %vm1138_vm12, %vm1139_vm9 }
 0x1ef   :  { %v878_v34 = vmul.f32 %v865_v51, %v1848_v59  ;;  %v875_v4 = vsel %vm874_vm6, %v1561_v52, %v871_v58  ;;  %v1134_v5 = vmul.f32 %v1565_v57, %v1133_v30  ;;  %893 = vst [vmem:[#allocation8 + $0x18] sm:$0xf] %v889_v61  ;;  %vm1130_vm15 = vmor %vm1128_vm14, %vm1129_vm11 }
 0x1f0   :  { %v1115_v40 = vmul.f32 0.5, %v1114_v60  ;;  %v879_v20 = vmul.f32 %v875_v4, %v1851_v6  ;;  %v1124_v7 = vmul.f32 %v1567_v62, %v1123_v46 }
 0x1f1   :  { %v882_v41 = vmul.f32 %v1877_v47, %v878_v34  ;;  %v1135_v2 = vmul.f32 0.5, %v1134_v5 }
 0x1f2   :  { %v1116_v8 = vsub.f32 1.5, %v1115_v40  ;;  %v883_v13 = vmul.f32 %v1877_v47, %v879_v20  ;;  %v1125_v59 = vmul.f32 0.5, %v1124_v7 }
 0x1f3   :  { %v886_v10 = vadd.f32 %v1883_v50, %v882_v41  ;;  %v1136_v53 = vsub.f32 1.5, %v1135_v2 }
 0x1f4   :  { %v1117_v14 = vmul.f32 %v1563_v55, %v1116_v8  ;;  %v887_v19 = vadd.f32 %v1883_v50, %v883_v13  ;;  %v1126_v44 = vsub.f32 1.5, %v1125_v59 }
 0x1f5   :  { %v890_v9 = vpack.c.bf16 %v886_v10, %v886_v10  ;;  %v1137_v1 = vmul.f32 %v1565_v57, %v1136_v53 }
 0x1f6   :  { %v1121_v6 = vsel %vm1120_vm10, %v1563_v55, %v1117_v14  ;;  %v891_v63 = vpack.c.bf16 %v887_v19, %v887_v19  ;;  %v1127_v3 = vmul.f32 %v1567_v62, %v1126_v44 }
 0x1f7   :  { %894 = vst [vmem:[#allocation8 + $0x28] sm:$0xf] %v890_v9  ;;  %v1143_v49 = vmul.f32 %v1121_v6, %v1858_v12  ;;  %v1141_v0 = vsel %vm1140_vm13, %v1565_v57, %v1137_v1 }
 0x1f8   :  { %895 = vst [vmem:[#allocation8 + $0x38] sm:$0xf] %v891_v63  ;;  %v1145_v22 = vmul.f32 %v1141_v0, %v1861_v15  ;;  %v1131_v16 = vsel %vm1130_vm15, %v1567_v62, %v1127_v3 }
 0x1f9   :  { %v1147_v21 = vmul.f32 %v1877_v47, %v1143_v49  ;;  %v1144_v23 = vmul.f32 %v1131_v16, %v1864_v11 }
 0x1fa   :  { %v1149_v27 = vmul.f32 %v1877_v47, %v1145_v22 }
 0x1fb   :  { %v1151_v17 = vadd.f32 %v1883_v50, %v1147_v21  ;;  %v1148_v12 = vmul.f32 %v1877_v47, %v1144_v23 }
 0x1fc   :  { %v1153_v28 = vadd.f32 %v1883_v50, %v1149_v27 }
 0x1fd   :  { %v1155_v42 = vpack.c.bf16 %v1151_v17, %v1151_v17  ;;  %v1152_v15 = vadd.f32 %v1883_v50, %v1148_v12 }
 0x1fe   :  { %v1157_v29 = vpack.c.bf16 %v1153_v28, %v1153_v28 }
 0x1ff   :  { %1159 = vst [vmem:[#allocation8 + $0x1c] sm:$0xf] %v1155_v42  ;;  %v1156_v11 = vpack.c.bf16 %v1152_v15, %v1152_v15 }
 0x200   :  { %1161 = vst [vmem:[#allocation8 + $0x3c] sm:$0xf] %v1157_v29 }
 0x201   :  { %1160 = vst [vmem:[#allocation8 + $0x2c] sm:$0xf] %v1156_v11 }
 0x202   :  { %1174 = dma.vmem_to_hbm [thread:$0]  %s1167_s4, 1024, %s1169_s15, [#allocation4], %s1671_s26, %s1671_s26, %s1672_s27  }
 0x203   :  { %1668 = dma.done.wait [#allocation4], 1024  }
 0x204   :  { %1669 = vsyncadd [#allocation4], 4294966272 }
 0x205   :  { %1179 = vsyncpa [#allocation3], 1 }
 0x206   :  { %1180 = vsyncpa [#allocation6], 1 }
 0x207   :  { %1181 = vsyncpa [#allocation4], 1 }

// kernel: tpu_custom_call.1
= control target key start
LH: loop header
LB: loop body
LE: loop exit
PB: predicated region body
PF: predicated region fallthrough
CT: control target
= control target key end

     0   :  { %10 = vsyncpa [#allocation3], 0  ;;  %s2002_s0 = inlined_call_operand.hbm [shape: bf16[32,256], index: 0, kind: input, shape index: {}]   ;;  %s2003_s1 = inlined_call_operand.hbm [shape: bf16[256,512], index: 1, kind: input, shape index: {}]   ;;  %s2004_s2 = inlined_call_operand.hbm [shape: f32[1,512], index: 2, kind: input, shape index: {}]   ;;  %s2005_s3 = inlined_call_operand.vmem [shape: f32[1,128], index: 3, kind: input, shape index: {}]   ;;  %s2006_s4 = inlined_call_operand.vmem [shape: f32[1,128], index: 4, kind: input, shape index: {}]   ;;  %s2007_s5 = inlined_call_operand.hbm [shape: bf16[32,512], index: 5, kind: output, shape index: {}]  }
   0x1   :  { %11 = vsyncpa [#allocation6], 0  ;;  %s30_s20 = sshll.u32 %s2003_s1, 4  ;;  %s31_s20 = int_to_ptr.hbm [resolvable:$true] %s30_s20 }
   0x2   :  { %12 = vsyncpa [#allocation4], 0  ;;  %s1670_s21 = smov [#allocation5]   ;;  %s17_s25 = sshll.u32 %s2002_s0, 4  ;;  %s18_s25 = int_to_ptr.hbm [resolvable:$true] %s17_s25 }
   0x3   :  { %s32_s22 = sshll.u32 %s1670_s21, 4  ;;  %s1671_s26 = smov 256   ;;  %s33_s22 = int_to_ptr.vmem [resolvable:$true] %s32_s22 }
   0x4   :  { %s1672_s27 = smov 16   ;;  %s1673_s28 = smov [#allocation2]  }
   0x5   :  { %38 = dma.hbm_to_vmem [thread:$0]  %s31_s20, 8192, %s33_s22, [#allocation6], %s1671_s26, %s1671_s26, %s1672_s27  }
   0x6   :  { %s19_s29 = sshll.u32 %s1673_s28, 4  ;;  %s1674_s1 = smov 128   ;;  %s20_s29 = int_to_ptr.vmem [resolvable:$true] %s19_s29 }
   0x7   :  { %s1675_s30 = smov 8   ;;  %s44_s8 = sshll.u32 %s2004_s2, 4  ;;  %s45_s8 = int_to_ptr.hbm [resolvable:$true] %s44_s8 }
   0x8   :  { %25 = dma.hbm_to_vmem [thread:$0]  %s18_s25, 512, %s20_s29, [#allocation3], %s1674_s1, %s1674_s1, %s1675_s30  }
   0x9   :  { %s1676_s9 = smov [#allocation7]  }
   0xa   :  { %s46_s0 = sshll.u32 %s1676_s9, 4  ;;  %s47_s0 = int_to_ptr.vmem [resolvable:$true] %s46_s0 }
   0xb   :  { %49 = dma.hbm_to_vmem [thread:$0]  %s45_s8, 64, %s47_s0, [#allocation6]  }
   0xc   :  { %1664 = dma.done.wait [#allocation3], 512  }
   0xd   :  { %1665 = vsyncadd [#allocation3], 4294966784 }
   0xe   :  { %1666 = dma.done.wait [#allocation6], 8256  }
   0xf   :  { %1667 = vsyncadd [#allocation6], 4294959040  ;;  %v1228_v0 = vld [vmem:[#allocation5 + $0xe0] sm:$0xf]  ;;  %v1465_v1 = vld [vmem:[#allocation5 + $0xec] sm:$0xf0] }
  0x10   :  { %v1260_v2 = vld [vmem:[#allocation5 + $0x1e0] sm:$0xf]  ;;  %v1229_v3 = vor.u32 %v1465_v1, %v1228_v0  ;;  %v1473_v4 = vld [vmem:[#allocation5 + $0x1ec] sm:$0xf0]  ;;  %v1292_v5 = vld [vmem:[#allocation5 + $0xe4] sm:$0xf] }
  0x11   :  { %v1481_v6 = vld [vmem:[#allocation5 + $0xf0] sm:$0xf0]  ;;  %v1261_v7 = vor.u32 %v1473_v4, %v1260_v2  ;;  %v1324_v9 = vld [vmem:[#allocation5 + $0x1e4] sm:$0xf]  ;;  %v1224_v11 = vld [vmem:[#allocation5 + $0xc0] sm:$0xf] }
  0x12   :  { %v1293_v8 = vor.u32 %v1481_v6, %v1292_v5  ;;  %v1489_v10 = vld [vmem:[#allocation5 + $0x1f0] sm:$0xf0]  ;;  %224 = vmatpush.bf16.msra.mxu0 %v1229_v3  ;;  %v1464_v13 = vld [vmem:[#allocation5 + $0xcc] sm:$0xf0]  ;;  %v1256_v14 = vld [vmem:[#allocation5 + $0x1c0] sm:$0xf] }
  0x13   :  { %v1325_v12 = vor.u32 %v1489_v10, %v1324_v9  ;;  %v1472_v15 = vld [vmem:[#allocation5 + $0x1cc] sm:$0xf0]  ;;  %243 = vmatpush.bf16.msra.mxu1 %v1261_v7  ;;  %v1225_v16 = vor.u32 %v1464_v13, %v1224_v11  ;;  %v1288_v18 = vld [vmem:[#allocation5 + $0xc4] sm:$0xf]  ;;  %v1480_v19 = vld [vmem:[#allocation5 + $0xd0] sm:$0xf0] }
  0x14   :  { %496 = vmatpush.bf16.msra.mxu2 %v1293_v8  ;;  %v1257_v17 = vor.u32 %v1472_v15, %v1256_v14  ;;  %v1320_v20 = vld [vmem:[#allocation5 + $0x1c4] sm:$0xf]  ;;  %v1289_v21 = vor.u32 %v1480_v19, %v1288_v18  ;;  %v1488_v22 = vld [vmem:[#allocation5 + $0x1d0] sm:$0xf0]  ;;  %v1220_v23 = vld [vmem:[#allocation5 + $0xa0] sm:$0xf] }
  0x15   :  { %515 = vmatpush.bf16.msra.mxu3 %v1325_v12  ;;  %v1463_v24 = vld [vmem:[#allocation5 + $0xac] sm:$0xf0]  ;;  %v1321_v25 = vor.u32 %v1488_v22, %v1320_v20  ;;  %v1252_v26 = vld [vmem:[#allocation5 + $0x1a0] sm:$0xf]  ;;  %v1284_v28 = vld [vmem:[#allocation5 + $0xa4] sm:$0xf] }
  0x16   :  { %v1471_v27 = vld [vmem:[#allocation5 + $0x1ac] sm:$0xf0]  ;;  %225 = vmatpush.bf16.msra.mxu0 %v1225_v16  ;;  %v1221_v29 = vor.u32 %v1463_v24, %v1220_v23  ;;  %v1479_v30 = vld [vmem:[#allocation5 + $0xb0] sm:$0xf0]  ;;  %v1316_v31 = vld [vmem:[#allocation5 + $0x1a4] sm:$0xf] }
  0x17   :  { %v1487_v32 = vld [vmem:[#allocation5 + $0x1b0] sm:$0xf0]  ;;  %244 = vmatpush.bf16.msra.mxu1 %v1257_v17  ;;  %v1253_v33 = vor.u32 %v1471_v27, %v1252_v26  ;;  %v1285_v34 = vor.u32 %v1479_v30, %v1284_v28  ;;  %v1216_v35 = vld [vmem:[#allocation5 + $0x80] sm:$0xf]  ;;  %v1462_v36 = vld [vmem:[#allocation5 + $0x8c] sm:$0xf0] }
  0x18   :  { %497 = vmatpush.bf16.msra.mxu2 %v1289_v21  ;;  %v1248_v37 = vld [vmem:[#allocation5 + $0x180] sm:$0xf]  ;;  %v1317_v38 = vor.u32 %v1487_v32, %v1316_v31  ;;  %v1470_v39 = vld [vmem:[#allocation5 + $0x18c] sm:$0xf0]  ;;  %v1280_v40 = vld [vmem:[#allocation5 + $0x84] sm:$0xf]  ;;  %v1217_v44 = vor.u32 %v1462_v36, %v1216_v35 }
  0x19   :  { %516 = vmatpush.bf16.msra.mxu3 %v1321_v25  ;;  %v1478_v41 = vld [vmem:[#allocation5 + $0x90] sm:$0xf0]  ;;  %v1312_v42 = vld [vmem:[#allocation5 + $0x184] sm:$0xf]  ;;  %v1249_v45 = vor.u32 %v1470_v39, %v1248_v37  ;;  %v1212_v47 = vld [vmem:[#allocation5 + $0x60] sm:$0xf] }
  0x1a   :  { %v1486_v43 = vld [vmem:[#allocation5 + $0x190] sm:$0xf0]  ;;  %226 = vmatpush.bf16.msra.mxu0 %v1221_v29  ;;  %v1281_v46 = vor.u32 %v1478_v41, %v1280_v40  ;;  %v1461_v48 = vld [vmem:[#allocation5 + $0x6c] sm:$0xf0]  ;;  %v1244_v49 = vld [vmem:[#allocation5 + $0x160] sm:$0xf] }
  0x1b   :  { %245 = vmatpush.bf16.msra.mxu1 %v1253_v33  ;;  %v1313_v50 = vor.u32 %v1486_v43, %v1312_v42  ;;  %v1469_v51 = vld [vmem:[#allocation5 + $0x16c] sm:$0xf0]  ;;  %v1276_v52 = vld [vmem:[#allocation5 + $0x64] sm:$0xf]  ;;  %v1477_v53 = vld [vmem:[#allocation5 + $0x70] sm:$0xf0]  ;;  %v1213_v56 = vor.u32 %v1461_v48, %v1212_v47 }
  0x1c   :  { %498 = vmatpush.bf16.msra.mxu2 %v1285_v34  ;;  %v1308_v54 = vld [vmem:[#allocation5 + $0x164] sm:$0xf]  ;;  %v1485_v55 = vld [vmem:[#allocation5 + $0x170] sm:$0xf0]  ;;  %v1245_v57 = vor.u32 %v1469_v51, %v1244_v49  ;;  %v1277_v58 = vor.u32 %v1477_v53, %v1276_v52  ;;  %v1208_v59 = vld [vmem:[#allocation5 + $0x40] sm:$0xf] }
  0x1d   :  { %517 = vmatpush.bf16.msra.mxu3 %v1317_v38  ;;  %v1460_v60 = vld [vmem:[#allocation5 + $0x4c] sm:$0xf0]  ;;  %v1240_v61 = vld [vmem:[#allocation5 + $0x140] sm:$0xf]  ;;  %v1309_v62 = vor.u32 %v1485_v55, %v1308_v54  ;;  %v1272_v0 = vld [vmem:[#allocation5 + $0x44] sm:$0xf] }
  0x1e   :  { %227 = vmatpush.bf16.msra.mxu0 %v1217_v44  ;;  %v1468_v63 = vld [vmem:[#allocation5 + $0x14c] sm:$0xf0]  ;;  %v1476_v1 = vld [vmem:[#allocation5 + $0x50] sm:$0xf0]  ;;  %v1304_v2 = vld [vmem:[#allocation5 + $0x144] sm:$0xf]  ;;  %v1209_v4 = vor.u32 %v1460_v60, %v1208_v59 }
  0x1f   :  { %246 = vmatpush.bf16.msra.mxu1 %v1249_v45  ;;  %v1484_v3 = vld [vmem:[#allocation5 + $0x150] sm:$0xf0]  ;;  %v1241_v5 = vor.u32 %v1468_v63, %v1240_v61  ;;  %v1273_v6 = vor.u32 %v1476_v1, %v1272_v0  ;;  %v1204_v7 = vld [vmem:[#allocation5 + $0x20] sm:$0xf]  ;;  %v1459_v8 = vld [vmem:[#allocation5 + $0x2c] sm:$0xf0] }
  0x20   :  { %499 = vmatpush.bf16.msra.mxu2 %v1281_v46  ;;  %v1236_v9 = vld [vmem:[#allocation5 + $0x120] sm:$0xf]  ;;  %v1305_v10 = vor.u32 %v1484_v3, %v1304_v2  ;;  %v1467_v11 = vld [vmem:[#allocation5 + $0x12c] sm:$0xf0]  ;;  %v1268_v12 = vld [vmem:[#allocation5 + $0x24] sm:$0xf]  ;;  %v1205_v16 = vor.u32 %v1459_v8, %v1204_v7 }
  0x21   :  { %518 = vmatpush.bf16.msra.mxu3 %v1313_v50  ;;  %v1475_v13 = vld [vmem:[#allocation5 + $0x30] sm:$0xf0]  ;;  %v1300_v14 = vld [vmem:[#allocation5 + $0x124] sm:$0xf]  ;;  %v1200_v17 = vld [vmem:[#allocation5] sm:$0xf]  ;;  %v1237_v19 = vor.u32 %v1467_v11, %v1236_v9 }
  0x22   :  { %228 = vmatpush.bf16.msra.mxu0 %v1213_v56  ;;  %v1483_v15 = vld [vmem:[#allocation5 + $0x130] sm:$0xf0]  ;;  %v1458_v18 = vld [vmem:[#allocation5 + $0xc] sm:$0xf0]  ;;  %v1269_v20 = vor.u32 %v1475_v13, %v1268_v12  ;;  %v1232_v21 = vld [vmem:[#allocation5 + $0x100] sm:$0xf] }
  0x23   :  { %247 = vmatpush.bf16.msra.mxu1 %v1245_v57  ;;  %v1466_v22 = vld [vmem:[#allocation5 + $0x10c] sm:$0xf0]  ;;  %v1264_v23 = vld [vmem:[#allocation5 + $0x4] sm:$0xf]  ;;  %v1301_v24 = vor.u32 %v1483_v15, %v1300_v14  ;;  %v1474_v25 = vld [vmem:[#allocation5 + $0x10] sm:$0xf0]  ;;  %v1201_v31 = vor.u32 %v1458_v18, %v1200_v17 }
  0x24   :  { %500 = vmatpush.bf16.msra.mxu2 %v1277_v58  ;;  %v1296_v26 = vld [vmem:[#allocation5 + $0x104] sm:$0xf]  ;;  %v1482_v27 = vld [vmem:[#allocation5 + $0x110] sm:$0xf0]  ;;  %v1184_v28 = vld [vmem:[#allocation2] sm:$0xf]  ;;  %v1233_v35 = vor.u32 %v1466_v22, %v1232_v21  ;;  %v1265_v36 = vor.u32 %v1474_v25, %v1264_v23 }
  0x25   :  { %519 = vmatpush.bf16.msra.mxu3 %v1309_v62  ;;  %v1356_v29 = vld [vmem:[#allocation5 + $0xe8] sm:$0xf]  ;;  %v1497_v30 = vld [vmem:[#allocation5 + $0xf4] sm:$0xf0]  ;;  %v1454_v37 = vld [vmem:[#allocation2 + $0x4] sm:$0xf]  ;;  %v1297_v39 = vor.u32 %v1482_v27, %v1296_v26 }
  0x26   :  { %229 = vmatpush.bf16.msra.mxu0 %v1209_v4  ;;  %v1455_v32 = vld [vmem:[#allocation2 + $0x4] sm:$0xf0]  ;;  %v1505_v34 = vld [vmem:[#allocation5 + $0x1f4] sm:$0xf0]  ;;  %v1186_v38 = vld [vmem:[#allocation2 + $0x8] sm:$0xf0]  ;;  %v1357_v40 = vor.u32 %v1497_v30, %v1356_v29 }
  0x27   :  { %248 = vmatpush.bf16.msra.mxu1 %v1241_v5  ;;  %v1388_v33 = vld [vmem:[#allocation5 + $0x1e8] sm:$0xf]  ;;  %v1420_v41 = vld [vmem:[#allocation5 + $0xec] sm:$0xf]  ;;  %v1513_v42 = vld [vmem:[#allocation5 + $0xf8] sm:$0xf0]  ;;  %v1720_v44 = vor.u32 %v1455_v32, %v1184_v28  ;;  %v1722_v49 = vor.u32 %v1454_v37, %v1186_v38 }
  0x28   :  { %501 = vmatpush.bf16.msra.mxu2 %v1273_v6  ;;  %v1452_v43 = vld [vmem:[#allocation5 + $0x1ec] sm:$0xf]  ;;  %v1389_v45 = vor.u32 %v1505_v34, %v1388_v33  ;;  %v1521_v46 = vld [vmem:[#allocation5 + $0x1f8] sm:$0xf0]  ;;  %v1352_v47 = vld [vmem:[#allocation5 + $0xc8] sm:$0xf]  ;;  %v1421_v52 = vor.u32 %v1513_v42, %v1420_v41 }
  0x29   :  { %520 = vmatpush.bf16.msra.mxu3 %v1305_v10  ;;  %v1496_v48 = vld [vmem:[#allocation5 + $0xd4] sm:$0xf0]  ;;  %v1384_v50 = vld [vmem:[#allocation5 + $0x1c8] sm:$0xf]  ;;  %v1453_v53 = vor.u32 %v1521_v46, %v1452_v43  ;;  %v1416_v55 = vld [vmem:[#allocation5 + $0xcc] sm:$0xf] }
  0x2a   :  { %230 = vmatpush.bf16.msra.mxu0 %v1205_v16  ;;  %v1504_v51 = vld [vmem:[#allocation5 + $0x1d4] sm:$0xf0]  ;;  %v1353_v54 = vor.u32 %v1496_v48, %v1352_v47  ;;  %v1512_v56 = vld [vmem:[#allocation5 + $0xd8] sm:$0xf0]  ;;  %v1448_v57 = vld [vmem:[#allocation5 + $0x1cc] sm:$0xf] }
  0x2b   :  { %249 = vmatpush.bf16.msra.mxu1 %v1237_v19  ;;  %v1385_v58 = vor.u32 %v1504_v51, %v1384_v50  ;;  %v1520_v59 = vld [vmem:[#allocation5 + $0x1d8] sm:$0xf0]  ;;  %v1348_v60 = vld [vmem:[#allocation5 + $0xa8] sm:$0xf]  ;;  %v1495_v61 = vld [vmem:[#allocation5 + $0xb4] sm:$0xf0]  ;;  %v1417_v0 = vor.u32 %v1512_v56, %v1416_v55 }
  0x2c   :  { %502 = vmatpush.bf16.msra.mxu2 %v1269_v20  ;;  %v1380_v62 = vld [vmem:[#allocation5 + $0x1a8] sm:$0xf]  ;;  %v1503_v63 = vld [vmem:[#allocation5 + $0x1b4] sm:$0xf0]  ;;  %v1449_v1 = vor.u32 %v1520_v59, %v1448_v57  ;;  %v1349_v2 = vor.u32 %v1495_v61, %v1348_v60  ;;  %v1412_v3 = vld [vmem:[#allocation5 + $0xac] sm:$0xf] }
  0x2d   :  { %521 = vmatpush.bf16.msra.mxu3 %v1301_v24  ;;  %v1511_v4 = vld [vmem:[#allocation5 + $0xb8] sm:$0xf0]  ;;  %v1444_v5 = vld [vmem:[#allocation5 + $0x1ac] sm:$0xf]  ;;  %v1381_v6 = vor.u32 %v1503_v63, %v1380_v62  ;;  %v1344_v8 = vld [vmem:[#allocation5 + $0x88] sm:$0xf] }
  0x2e   :  { %231 = vmatpush.bf16.msra.mxu0 %v1201_v31  ;;  %v1519_v7 = vld [vmem:[#allocation5 + $0x1b8] sm:$0xf0]  ;;  %v1494_v9 = vld [vmem:[#allocation5 + $0x94] sm:$0xf0]  ;;  %v1376_v10 = vld [vmem:[#allocation5 + $0x188] sm:$0xf]  ;;  %v1413_v12 = vor.u32 %v1511_v4, %v1412_v3 }
  0x2f   :  { %250 = vmatpush.bf16.msra.mxu1 %v1233_v35  ;;  %v1502_v11 = vld [vmem:[#allocation5 + $0x194] sm:$0xf0]  ;;  %v1408_v13 = vld [vmem:[#allocation5 + $0x8c] sm:$0xf]  ;;  %v1510_v14 = vld [vmem:[#allocation5 + $0x98] sm:$0xf0]  ;;  %v1445_v16 = vor.u32 %v1519_v7, %v1444_v5  ;;  %v1345_v17 = vor.u32 %v1494_v9, %v1344_v8 }
  0x30   :  { %503 = vmatpush.bf16.msra.mxu2 %v1265_v36  ;;  %v1440_v15 = vld [vmem:[#allocation5 + $0x18c] sm:$0xf]  ;;  %v1518_v18 = vld [vmem:[#allocation5 + $0x198] sm:$0xf0]  ;;  %v1192_v19 = vld [vmem:[#allocation2 + $0x10] sm:$0xf]  ;;  %v1377_v21 = vor.u32 %v1502_v11, %v1376_v10  ;;  %v1409_v30 = vor.u32 %v1510_v14, %v1408_v13 }
  0x31   :  { %522 = vmatpush.bf16.msra.mxu3 %v1297_v39  ;;  %232 = vmatmul.bf16.vlgmr.msra.gmra.mxu0 %v1720_v44  ;;  %v1457_v20 = vld [vmem:[#allocation2 + $0x14] sm:$0xf0]  ;;  %v1456_v22 = vld [vmem:[#allocation2 + $0x14] sm:$0xf]  ;;  %v1194_v23 = vld [vmem:[#allocation2 + $0x18] sm:$0xf0]  ;;  %v1441_v34 = vor.u32 %v1518_v18, %v1440_v15 }
  0x32   :  { %762 = vmatpush.bf16.msrb.mxu0 %v1357_v40  ;;  %251 = vmatmul.bf16.vlgmr.msra.gmra.mxu1 %v1722_v49  ;;  %v1340_v24 = vld [vmem:[#allocation5 + $0x68] sm:$0xf]  ;;  %v1493_v25 = vld [vmem:[#allocation5 + $0x74] sm:$0xf0]  ;;  %v1404_v28 = vld [vmem:[#allocation5 + $0x6c] sm:$0xf]  ;;  %v1728_v37 = vor.u32 %v1457_v20, %v1192_v19  ;;  %v1730_v39 = vor.u32 %v1456_v22, %v1194_v23 }
  0x33   :  { %781 = vmatpush.bf16.msrb.mxu1 %v1389_v45  ;;  %504 = vmatmul.bf16.vlgmr.msra.gmra.mxu2 %v1720_v44  ;;  %v1372_v26 = vld [vmem:[#allocation5 + $0x168] sm:$0xf]  ;;  %v1501_v27 = vld [vmem:[#allocation5 + $0x174] sm:$0xf0]  ;;  %v1509_v29 = vld [vmem:[#allocation5 + $0x78] sm:$0xf0]  ;;  %v1341_v35 = vor.u32 %v1493_v25, %v1340_v24 }
  0x34   :  { %523 = vmatmul.bf16.vlgmr.msra.gmra.mxu3 %v1722_v49  ;;  %1028 = vmatpush.bf16.msrb.mxu2 %v1421_v52  ;;  %v1436_v31 = vld [vmem:[#allocation5 + $0x16c] sm:$0xf]  ;;  %v1517_v32 = vld [vmem:[#allocation5 + $0x178] sm:$0xf0]  ;;  %v1336_v33 = vld [vmem:[#allocation5 + $0x48] sm:$0xf]  ;;  %v1373_v38 = vor.u32 %v1501_v27, %v1372_v26  ;;  %v1405_v42 = vor.u32 %v1509_v29, %v1404_v28 }
  0x35   :  { %1047 = vmatpush.bf16.msrb.mxu3 %v1453_v53  ;;  %v1492_v36 = vld [vmem:[#allocation5 + $0x54] sm:$0xf0]  ;;  %v1368_v40 = vld [vmem:[#allocation5 + $0x148] sm:$0xf]  ;;  %v1437_v43 = vor.u32 %v1517_v32, %v1436_v31  ;;  %v1400_v46 = vld [vmem:[#allocation5 + $0x4c] sm:$0xf] }
  0x36   :  { %763 = vmatpush.bf16.msrb.mxu0 %v1353_v54  ;;  %v1500_v41 = vld [vmem:[#allocation5 + $0x154] sm:$0xf0]  ;;  %v1337_v45 = vor.u32 %v1492_v36, %v1336_v33  ;;  %v1508_v47 = vld [vmem:[#allocation5 + $0x58] sm:$0xf0]  ;;  %v1432_v48 = vld [vmem:[#allocation5 + $0x14c] sm:$0xf] }
  0x37   :  { %782 = vmatpush.bf16.msrb.mxu1 %v1385_v58  ;;  %v1369_v50 = vor.u32 %v1500_v41, %v1368_v40  ;;  %v1516_v51 = vld [vmem:[#allocation5 + $0x158] sm:$0xf0]  ;;  %v1332_v52 = vld [vmem:[#allocation5 + $0x28] sm:$0xf]  ;;  %v1491_v53 = vld [vmem:[#allocation5 + $0x34] sm:$0xf0]  ;;  %v1401_v56 = vor.u32 %v1508_v47, %v1400_v46 }
  0x38   :  { %1029 = vmatpush.bf16.msrb.mxu2 %v1417_v0  ;;  %v1364_v54 = vld [vmem:[#allocation5 + $0x128] sm:$0xf]  ;;  %v1499_v55 = vld [vmem:[#allocation5 + $0x134] sm:$0xf0]  ;;  %v1433_v57 = vor.u32 %v1516_v51, %v1432_v48  ;;  %v1333_v58 = vor.u32 %v1491_v53, %v1332_v52  ;;  %v1396_v59 = vld [vmem:[#allocation5 + $0x2c] sm:$0xf] }
  0x39   :  { %1048 = vmatpush.bf16.msrb.mxu3 %v1449_v1  ;;  %v1507_v60 = vld [vmem:[#allocation5 + $0x38] sm:$0xf0]  ;;  %v1428_v61 = vld [vmem:[#allocation5 + $0x12c] sm:$0xf]  ;;  %v1365_v62 = vor.u32 %v1499_v55, %v1364_v54  ;;  %v1328_v0 = vld [vmem:[#allocation5 + $0x8] sm:$0xf] }
  0x3a   :  { %764 = vmatpush.bf16.msrb.mxu0 %v1349_v2  ;;  %v1515_v63 = vld [vmem:[#allocation5 + $0x138] sm:$0xf0]  ;;  %v1490_v1 = vld [vmem:[#allocation5 + $0x14] sm:$0xf0]  ;;  %v1360_v2 = vld [vmem:[#allocation5 + $0x108] sm:$0xf]  ;;  %v1397_v4 = vor.u32 %v1507_v60, %v1396_v59 }
  0x3b   :  { %783 = vmatpush.bf16.msrb.mxu1 %v1381_v6  ;;  %v1498_v3 = vld [vmem:[#allocation5 + $0x114] sm:$0xf0]  ;;  %v1429_v5 = vor.u32 %v1515_v63, %v1428_v61  ;;  %v1329_v6 = vor.u32 %v1490_v1, %v1328_v0  ;;  %v1392_v7 = vld [vmem:[#allocation5 + $0xc] sm:$0xf]  ;;  %v1506_v8 = vld [vmem:[#allocation5 + $0x18] sm:$0xf0] }
  0x3c   :  { %1030 = vmatpush.bf16.msrb.mxu2 %v1413_v12  ;;  %v1361_v9 = vor.u32 %v1498_v3, %v1360_v2  ;;  %v1424_v10 = vld [vmem:[#allocation5 + $0x10c] sm:$0xf]  ;;  %v1514_v11 = vld [vmem:[#allocation5 + $0x118] sm:$0xf0]  ;;  %v1393_v12 = vor.u32 %v1506_v8, %v1392_v7  ;;  %v1530_v14 = vld [vmem:[#allocation7] ss:$0 sm:$0xff] }
  0x3d   :  { %1049 = vmatpush.bf16.msrb.mxu3 %v1445_v16  ;;  %v1425_v13 = vor.u32 %v1514_v11, %v1424_v10  ;;  %v1531_v19 = vld [vmem:[#allocation7 + $0x1] ss:$0 sm:$0xff]  ;;  %v1533_v53 = vld [vmem:[#allocation7 + $0x3] ss:$0 sm:$0xff]  ;;  %s1168_s15 = sshll.u32 %s2007_s5, 4  ;;  %s1169_s15 = int_to_ptr.hbm [resolvable:$true] %s1168_s15 }
  0x3e   :  { %765 = vmatpush.bf16.msrb.mxu0 %v1345_v17 }
  0x3f   :  { %784 = vmatpush.bf16.msrb.mxu1 %v1377_v21 }
  0x40   :  { %1031 = vmatpush.bf16.msrb.mxu2 %v1409_v30 }
  0x41   :  { %1050 = vmatpush.bf16.msrb.mxu3 %v1441_v34  ;;  %237 = vmatmul.bf16.gmra.mxu0 %v1728_v37 }
  0x42   :  { %766 = vmatpush.bf16.msrb.mxu0 %v1341_v35  ;;  %256 = vmatmul.bf16.gmra.mxu1 %v1730_v39 }
  0x43   :  { %785 = vmatpush.bf16.msrb.mxu1 %v1373_v38  ;;  %509 = vmatmul.bf16.gmra.mxu2 %v1728_v37 }
  0x44   :  { %528 = vmatmul.bf16.gmra.mxu3 %v1730_v39  ;;  %1032 = vmatpush.bf16.msrb.mxu2 %v1405_v42  ;;  %v1532_v42 = vld [vmem:[#allocation7 + $0x2] ss:$0 sm:$0xff] }
  0x45   :  { %1051 = vmatpush.bf16.msrb.mxu3 %v1437_v43 }
  0x46   :  { %767 = vmatpush.bf16.msrb.mxu0 %v1337_v45 }
  0x47   :  { %786 = vmatpush.bf16.msrb.mxu1 %v1369_v50 }
  0x48   :  { %1033 = vmatpush.bf16.msrb.mxu2 %v1401_v56 }
  0x49   :  { %1052 = vmatpush.bf16.msrb.mxu3 %v1433_v57 }
  0x4a   :  { %768 = vmatpush.bf16.msrb.mxu0 %v1333_v58 }
  0x4b   :  { %787 = vmatpush.bf16.msrb.mxu1 %v1365_v62 }
  0x4c   :  { %1034 = vmatpush.bf16.msrb.mxu2 %v1397_v4 }
  0x4d   :  { %1053 = vmatpush.bf16.msrb.mxu3 %v1429_v5 }
  0x4e   :  { %769 = vmatpush.bf16.msrb.mxu0 %v1329_v6 }
  0x4f   :  { %788 = vmatpush.bf16.msrb.mxu1 %v1361_v9 }
  0x50   :  { %1035 = vmatpush.bf16.msrb.mxu2 %v1393_v12 }
  0x51   :  { %1054 = vmatpush.bf16.msrb.mxu3 %v1425_v13  ;;  %770 = vmatmul.bf16.vlgmr.msrb.gmra.mxu0 %v1720_v44 }
  0x52   :  { %789 = vmatmul.bf16.vlgmr.msrb.gmra.mxu1 %v1722_v49 }
  0x53   :  { %1036 = vmatmul.bf16.vlgmr.msrb.gmra.mxu2 %v1720_v44 }
  0x54   :  { %1055 = vmatmul.bf16.vlgmr.msrb.gmra.mxu3 %v1722_v49 }
  0x61   :  { %775 = vmatmul.bf16.gmra.mxu0 %v1728_v37 }
  0x62   :  { %794 = vmatmul.bf16.gmra.mxu1 %v1730_v39 }
  0x63   :  { %1041 = vmatmul.bf16.gmra.mxu2 %v1728_v37 }
  0x64   :  { %1060 = vmatmul.bf16.gmra.mxu3 %v1730_v39 }
  0xae   :  { %v233_v15 = vpop.f32.mrf.mxu0 }
  0xaf   :  { %v234_v16 = vadd.f32 %v1530_v14, %v233_v15  ;;  %v252_v17 = vpop.f32.mrf.mxu1 }
  0xb1   :  { %v1744_v18 = vadd.f32 %v252_v17, %v234_v16 }
  0xb3   :  { %262 = vadd.xlane.f32.xlu0 %v1744_v18 }
  0xb6   :  { %v505_v44 = vpop.f32.mrf.mxu2  ;;  %v235_v21 = vpop.f32.mrf.mxu0 }
  0xb7   :  { %v506_v20 = vadd.f32 %v1531_v19, %v505_v44  ;;  %v524_v49 = vpop.f32.mrf.mxu3  ;;  %v236_v22 = vadd.f32 %v1530_v14, %v235_v21  ;;  %v254_v23 = vpop.f32.mrf.mxu1 }
  0xb9   :  { %v1747_v24 = vadd.f32 %v524_v49, %v506_v20  ;;  %v1749_v25 = vadd.f32 %v254_v23, %v236_v22 }
  0xbb   :  { %534 = vadd.xlane.f32.xlu2 %v1747_v24  ;;  %264 = vadd.xlane.f32.xlu0 %v1749_v25 }
  0xbe   :  { %v507_v26 = vpop.f32.mrf.mxu2  ;;  %v238_v29 = vpop.f32.mrf.mxu0 }
  0xbf   :  { %v508_v27 = vadd.f32 %v1531_v19, %v507_v26  ;;  %v526_v28 = vpop.f32.mrf.mxu3  ;;  %v239_v30 = vadd.f32 %v1530_v14, %v238_v29  ;;  %v257_v31 = vpop.f32.mrf.mxu1 }
  0xc1   :  { %v1753_v32 = vadd.f32 %v526_v28, %v508_v27  ;;  %v1755_v33 = vadd.f32 %v257_v31, %v239_v30 }
  0xc3   :  { %536 = vadd.xlane.f32.xlu2 %v1753_v32  ;;  %266 = vadd.xlane.f32.xlu1 %v1755_v33 }
  0xc6   :  { %v510_v34 = vpop.f32.mrf.mxu2  ;;  %v240_v37 = vpop.f32.mrf.mxu0 }
  0xc7   :  { %v511_v35 = vadd.f32 %v1531_v19, %v510_v34  ;;  %v529_v36 = vpop.f32.mrf.mxu3  ;;  %v241_v38 = vadd.f32 %v1530_v14, %v240_v37  ;;  %v259_v39 = vpop.f32.mrf.mxu1 }
  0xc9   :  { %v1759_v40 = vadd.f32 %v529_v36, %v511_v35  ;;  %v1761_v41 = vadd.f32 %v259_v39, %v241_v38 }
  0xcb   :  { %538 = vadd.xlane.f32.xlu0 %v1759_v40  ;;  %268 = vadd.xlane.f32.xlu1 %v1761_v41 }
  0xce   :  { %v512_v43 = vpop.f32.mrf.mxu2  ;;  %v771_v47 = vpop.f32.mrf.mxu0 }
  0xcf   :  { %v513_v45 = vadd.f32 %v1531_v19, %v512_v43  ;;  %v531_v46 = vpop.f32.mrf.mxu3  ;;  %v772_v48 = vadd.f32 %v1532_v42, %v771_v47  ;;  %v790_v50 = vpop.f32.mrf.mxu1 }
  0xd1   :  { %v1765_v51 = vadd.f32 %v531_v46, %v513_v45  ;;  %v1767_v52 = vadd.f32 %v790_v50, %v772_v48 }
  0xd3   :  { %800 = vadd.xlane.f32.xlu2 %v1767_v52  ;;  %540 = vadd.xlane.f32.xlu1 %v1765_v51 }
  0xd6   :  { %v1037_v54 = vpop.f32.mrf.mxu2  ;;  %v773_v57 = vpop.f32.mrf.mxu0 }
  0xd7   :  { %v1038_v55 = vadd.f32 %v1533_v53, %v1037_v54  ;;  %v1056_v56 = vpop.f32.mrf.mxu3  ;;  %v792_v58 = vpop.f32.mrf.mxu1  ;;  %v774_v60 = vadd.f32 %v1532_v42, %v773_v57 }
  0xd9   :  { %v1771_v59 = vadd.f32 %v1056_v56, %v1038_v55  ;;  %v1774_v2 = vadd.f32 %v792_v58, %v774_v60 }
  0xdb   :  { %1066 = vadd.xlane.f32.xlu0 %v1771_v59 }
  0xde   :  { %v1039_v61 = vpop.f32.mrf.mxu2  ;;  %v776_v0 = vpop.f32.mrf.mxu0 }
  0xdf   :  { %v1040_v62 = vadd.f32 %v1533_v53, %v1039_v61  ;;  %v1058_v63 = vpop.f32.mrf.mxu3  ;;  %v795_v1 = vpop.f32.mrf.mxu1  ;;  %v777_v4 = vadd.f32 %v1532_v42, %v776_v0 }
  0xe1   :  { %v1776_v3 = vadd.f32 %v1058_v63, %v1040_v62  ;;  %v1780_v9 = vadd.f32 %v795_v1, %v777_v4 }
  0xe3   :  { %1068 = vadd.xlane.f32.xlu1 %v1776_v3  ;;  %802 = vadd.xlane.f32.xlu0 %v1774_v2 }
  0xe6   :  { %v1042_v5 = vpop.f32.mrf.mxu2  ;;  %v778_v7 = vpop.f32.mrf.mxu0 }
  0xe7   :  { %v1061_v6 = vpop.f32.mrf.mxu3  ;;  %v779_v8 = vadd.f32 %v1532_v42, %v778_v7  ;;  %v797_v10 = vpop.f32.mrf.mxu1  ;;  %v1043_v12 = vadd.f32 %v1533_v53, %v1042_v5 }
  0xe9   :  { %v1782_v11 = vadd.f32 %v797_v10, %v779_v8  ;;  %v1788_v17 = vadd.f32 %v1061_v6, %v1043_v12 }
  0xeb   :  { %804 = vadd.xlane.f32.xlu1 %v1780_v9  ;;  %806 = vadd.xlane.f32.xlu2 %v1782_v11 }
  0xee   :  { %v1044_v13 = vpop.f32.mrf.mxu2 }
  0xef   :  { %v1045_v14 = vadd.f32 %v1533_v53, %v1044_v13  ;;  %v1063_v15 = vpop.f32.mrf.mxu3 }
  0xf1   :  { %v1786_v16 = vadd.f32 %v1063_v15, %v1045_v14 }
  0xf3   :  { %1072 = vadd.xlane.f32.xlu0 %v1786_v16  ;;  %1070 = vadd.xlane.f32.xlu2 %v1788_v17 }
 0x126   :  { %v263_v19 = vpop.xlane.xlu0 %262 }
 0x127   :  { %v270_v44 = vmul.f32 0.0078125, %v263_v19 }
 0x129   :  { %v1793_v20 = vsub.f32 %v1744_v18, %v270_v44 }
 0x12b   :  { %v278_v49 = vmul.f32 %v1793_v20, %v1793_v20 }
 0x12d   :  { %282 = vadd.xlane.f32.xlu1 %v278_v49 }
 0x12e   :  { %v535_v21 = vpop.xlane.xlu2 %534  ;;  %v265_v23 = vpop.xlane.xlu0 %264 }
 0x12f   :  { %v542_v22 = vmul.f32 0.0078125, %v535_v21  ;;  %v271_v27 = vmul.f32 0.0078125, %v265_v23 }
 0x131   :  { %v1798_v26 = vsub.f32 %v1747_v24, %v542_v22  ;;  %v1803_v30 = vsub.f32 %v1749_v25, %v271_v27 }
 0x133   :  { %v550_v28 = vmul.f32 %v1798_v26, %v1798_v26  ;;  %v279_v24 = vmul.f32 %v1803_v30, %v1803_v30 }
 0x135   :  { %554 = vadd.xlane.f32.xlu2 %v550_v28 }
 0x136   :  { %v537_v29 = vpop.xlane.xlu2 %536  ;;  %v267_v31 = vpop.xlane.xlu1 %266 }
 0x137   :  { %v543_v18 = vmul.f32 0.0078125, %v537_v29  ;;  %v272_v35 = vmul.f32 0.0078125, %v267_v31 }
 0x139   :  { %v1806_v34 = vsub.f32 %v1753_v32, %v543_v18  ;;  %v1813_v38 = vsub.f32 %v1755_v33, %v272_v35 }
 0x13b   :  { %v551_v36 = vmul.f32 %v1806_v34, %v1806_v34  ;;  %v280_v43 = vmul.f32 %v1813_v38, %v1813_v38 }
 0x13d   :  { %556 = vadd.xlane.f32.xlu0 %v551_v36  ;;  %284 = vadd.xlane.f32.xlu2 %v279_v24 }
 0x13e   :  { %v539_v37 = vpop.xlane.xlu0 %538  ;;  %v269_v39 = vpop.xlane.xlu1 %268 }
 0x13f   :  { %v544_v25 = vmul.f32 0.0078125, %v539_v37  ;;  %v273_v32 = vmul.f32 0.0078125, %v269_v39 }
 0x141   :  { %v1816_v42 = vsub.f32 %v1759_v40, %v544_v25  ;;  %v1823_v46 = vsub.f32 %v1761_v41, %v273_v32 }
 0x143   :  { %v552_v45 = vmul.f32 %v1816_v42, %v1816_v42  ;;  %v281_v54 = vmul.f32 %v1823_v46, %v1823_v46 }
 0x145   :  { %286 = vadd.xlane.f32.xlu0 %v280_v43  ;;  %558 = vadd.xlane.f32.xlu1 %v552_v45 }
 0x146   :  { %v801_v47 = vpop.xlane.xlu2 %800  ;;  %v541_v33 = vpop.xlane.xlu1 %540 }
 0x147   :  { %v808_v48 = vmul.f32 0.0078125, %v801_v47  ;;  %v545_v50 = vmul.f32 0.0078125, %v541_v33  ;;  %v1877_v47 = vld [vmem:[%s2005_s3] ss:$0 sm:$0xff]  ;;  %s1677_s3 = smov [#allocation8]  }
 0x149   :  { %v1826_v53 = vsub.f32 %v1767_v52, %v808_v48  ;;  %v1829_v40 = vsub.f32 %v1765_v51, %v545_v50  ;;  %v1883_v50 = vld [vmem:[%s2006_s4] ss:$0 sm:$0xff]  ;;  %s1166_s4 = sshll.u32 %s1677_s3, 4  ;;  %s1167_s4 = int_to_ptr.vmem [resolvable:$true] %s1166_s4 }
 0x14b   :  { %v816_v55 = vmul.f32 %v1826_v53, %v1826_v53  ;;  %v553_v41 = vmul.f32 %v1829_v40, %v1829_v40 }
 0x14d   :  { %288 = vadd.xlane.f32.xlu1 %v281_v54  ;;  %820 = vadd.xlane.f32.xlu0 %v816_v55 }
 0x14e   :  { %v1067_v56 = vpop.xlane.xlu0 %1066  ;;  %560 = vadd.xlane.f32.xlu2 %v553_v41 }
 0x14f   :  { %v1074_v57 = vmul.f32 0.0078125, %v1067_v56 }
 0x151   :  { %v1838_v52 = vsub.f32 %v1771_v59, %v1074_v57 }
 0x153   :  { %v1082_v51 = vmul.f32 %v1838_v52, %v1838_v52 }
 0x155   :  { %1086 = vadd.xlane.f32.xlu1 %v1082_v51 }
 0x156   :  { %v1069_v58 = vpop.xlane.xlu1 %1068  ;;  %v803_v60 = vpop.xlane.xlu0 %802 }
 0x157   :  { %v809_v61 = vmul.f32 0.0078125, %v803_v60  ;;  %v1075_v7 = vmul.f32 0.0078125, %v1069_v58 }
 0x159   :  { %v1843_v62 = vsub.f32 %v1774_v2, %v809_v61  ;;  %v1858_v12 = vsub.f32 %v1776_v3, %v1075_v7 }
 0x15b   :  { %v817_v63 = vmul.f32 %v1843_v62, %v1843_v62  ;;  %v1083_v19 = vmul.f32 %v1858_v12, %v1858_v12 }
 0x15d   :  { %822 = vadd.xlane.f32.xlu1 %v817_v63 }
 0x15e   :  { %v805_v0 = vpop.xlane.xlu1 %804  ;;  %v807_v4 = vpop.xlane.xlu2 %806 }
 0x15f   :  { %v810_v1 = vmul.f32 0.0078125, %v805_v0  ;;  %v811_v5 = vmul.f32 0.0078125, %v807_v4 }
 0x161   :  { %v1848_v59 = vsub.f32 %v1780_v9, %v810_v1  ;;  %v1851_v6 = vsub.f32 %v1782_v11, %v811_v5 }
 0x163   :  { %v818_v8 = vmul.f32 %v1848_v59, %v1848_v59  ;;  %v819_v2 = vmul.f32 %v1851_v6, %v1851_v6 }
 0x165   :  { %824 = vadd.xlane.f32.xlu2 %v818_v8  ;;  %826 = vadd.xlane.f32.xlu0 %v819_v2 }
 0x166   :  { %v1073_v10 = vpop.xlane.xlu0 %1072  ;;  %v1071_v14 = vpop.xlane.xlu2 %1070 }
 0x167   :  { %v1077_v13 = vmul.f32 0.0078125, %v1073_v10  ;;  %v1076_v9 = vmul.f32 0.0078125, %v1071_v14 }
 0x169   :  { %v1861_v15 = vsub.f32 %v1786_v16, %v1077_v13  ;;  %v1864_v11 = vsub.f32 %v1788_v17, %v1076_v9 }
 0x16b   :  { %v1085_v44 = vmul.f32 %v1861_v15, %v1861_v15  ;;  %v1084_v49 = vmul.f32 %v1864_v11, %v1864_v11 }
 0x16d   :  { %1088 = vadd.xlane.f32.xlu2 %v1083_v19  ;;  %1092 = vadd.xlane.f32.xlu1 %v1085_v44 }
 0x16e   :  { %1090 = vadd.xlane.f32.xlu0 %v1084_v49 }
 0x1a0   :  { %v283_v3 = vpop.xlane.xlu1 %282 }
 0x1a1   :  { %v290_v21 = vmul.f32 0.0078125, %v283_v3 }
 0x1a3   :  { %v294_v22 = vadd.f32 1e-05, %v290_v21 }
 0x1a5   :  { %1536 = vrsqrt.f32 %v294_v22  ;;  %vm304_vm1 = vweird.f32 %v294_v22 }
 0x1a8   :  { %v555_v16 = vpop.xlane.xlu2 %554 }
 0x1a9   :  { %v562_v23 = vmul.f32 0.0078125, %v555_v16 }
 0x1ab   :  { %v566_v17 = vadd.f32 1e-05, %v562_v23  ;;  %v1537_v27 = vpop.eup %1536 }
 0x1ac   :  { %v299_v28 = vmul.f32 %v1537_v27, %v294_v22  ;;  %vm305_vm0 = vweird.f32 %v1537_v27 }
 0x1ad   :  { %1538 = vrsqrt.f32 %v566_v17  ;;  %vm306_vm2 = vmor %vm304_vm1, %vm305_vm0  ;;  %vm576_vm4 = vweird.f32 %v566_v17 }
 0x1ae   :  { %v300_v29 = vmul.f32 %v1537_v27, %v299_v28 }
 0x1b0   :  { %v285_v18 = vpop.xlane.xlu2 %284  ;;  %v557_v31 = vpop.xlane.xlu0 %556  ;;  %v301_v35 = vmul.f32 0.5, %v300_v29 }
 0x1b1   :  { %v291_v36 = vmul.f32 0.0078125, %v285_v18  ;;  %v563_v24 = vmul.f32 0.0078125, %v557_v31 }
 0x1b2   :  { %v302_v25 = vsub.f32 1.5, %v301_v35 }
 0x1b3   :  { %v1539_v37 = vpop.eup %1538  ;;  %v295_v39 = vadd.f32 1e-05, %v291_v36  ;;  %v1872_v32 = vadd.f32 1e-05, %v563_v24 }
 0x1b4   :  { %v571_v43 = vmul.f32 %v1539_v37, %v566_v17  ;;  %v303_v45 = vmul.f32 %v1537_v27, %v302_v25  ;;  %vm577_vm3 = vweird.f32 %v1539_v37 }
 0x1b5   :  { %1540 = vrsqrt.f32 %v295_v39  ;;  %vm578_vm5 = vmor %vm576_vm4, %vm577_vm3  ;;  %vm314_vm6 = vweird.f32 %v295_v39  ;;  %vm586_vm10 = vweird.f32 %v1872_v32 }
 0x1b6   :  { %v572_v33 = vmul.f32 %v1539_v37, %v571_v43  ;;  %1542 = vrsqrt.f32 %v1872_v32  ;;  %v307_v48 = vsel %vm306_vm2, %v1537_v27, %v303_v45 }
 0x1b7   :  { %v338_v54 = vmul.f32 %v307_v48, %v1793_v20 }
 0x1b8   :  { %v573_v55 = vmul.f32 0.5, %v572_v33  ;;  %v559_v41 = vpop.xlane.xlu1 %558  ;;  %v287_v56 = vpop.xlane.xlu0 %286 }
 0x1b9   :  { %v564_v57 = vmul.f32 0.0078125, %v559_v41  ;;  %v292_v51 = vmul.f32 0.0078125, %v287_v56  ;;  %v345_v58 = vmul.f32 %v1877_v47, %v338_v54 }
 0x1ba   :  { %v574_v60 = vsub.f32 1.5, %v573_v55 }
 0x1bb   :  { %v1541_v61 = vpop.eup %1540  ;;  %v1887_v63 = vadd.f32 1e-05, %v564_v57  ;;  %v1889_v0 = vadd.f32 1e-05, %v292_v51  ;;  %v352_v4 = vadd.f32 %v1883_v50, %v345_v58 }
 0x1bc   :  { %v1543_v1 = vpop.eup %1542  ;;  %v575_v5 = vmul.f32 %v1539_v37, %v574_v60  ;;  %v309_v20 = vmul.f32 %v1541_v61, %v295_v39  ;;  %vm315_vm7 = vweird.f32 %v1541_v61 }
 0x1bd   :  { %v581_v7 = vmul.f32 %v1543_v1, %v1872_v32  ;;  %1544 = vrsqrt.f32 %v1887_v63  ;;  %v356_v8 = vpack.c.bf16 %v352_v4, %v352_v4  ;;  %vm587_vm8 = vweird.f32 %v1543_v1  ;;  %vm316_vm9 = vmor %vm314_vm6, %vm315_vm7 }
 0x1be   :  { %v579_v2 = vsel %vm578_vm5, %v1539_v37, %v575_v5  ;;  %v310_v10 = vmul.f32 %v1541_v61, %v309_v20  ;;  %1546 = vrsqrt.f32 %v1889_v0  ;;  %vm588_vm11 = vmor %vm586_vm10, %vm587_vm8  ;;  %vm596_vm14 = vweird.f32 %v1887_v63 }
 0x1bf   :  { %v610_v13 = vmul.f32 %v579_v2, %v1798_v26  ;;  %v582_v14 = vmul.f32 %v1543_v1, %v581_v7  ;;  %360 = vst [vmem:[#allocation8] sm:$0xf] %v356_v8  ;;  %vm324_vm0 = vweird.f32 %v1889_v0 }
 0x1c0   :  { %v311_v9 = vmul.f32 0.5, %v310_v10  ;;  %v289_v19 = vpop.xlane.xlu1 %288  ;;  %v821_v22 = vpop.xlane.xlu0 %820 }
 0x1c1   :  { %v614_v44 = vmul.f32 %v1877_v47, %v610_v13  ;;  %v583_v49 = vmul.f32 0.5, %v582_v14  ;;  %v293_v3 = vmul.f32 0.0078125, %v289_v19  ;;  %v561_v21 = vpop.xlane.xlu2 %560  ;;  %v828_v36 = vmul.f32 0.0078125, %v821_v22 }
 0x1c2   :  { %v312_v16 = vsub.f32 1.5, %v311_v9  ;;  %v565_v23 = vmul.f32 0.0078125, %v561_v21 }
 0x1c3   :  { %v1545_v17 = vpop.eup %1544  ;;  %v618_v27 = vadd.f32 %v1883_v50, %v614_v44  ;;  %v584_v28 = vsub.f32 1.5, %v583_v49  ;;  %v1898_v26 = vadd.f32 1e-05, %v293_v3  ;;  %v1909_v41 = vadd.f32 1e-05, %v828_v36 }
 0x1c4   :  { %v1547_v29 = vpop.eup %1546  ;;  %v313_v18 = vmul.f32 %v1541_v61, %v312_v16  ;;  %v591_v31 = vmul.f32 %v1545_v17, %v1887_v63  ;;  %v1901_v35 = vadd.f32 1e-05, %v565_v23  ;;  %vm597_vm12 = vweird.f32 %v1545_v17 }
 0x1c5   :  { %v622_v24 = vpack.c.bf16 %v618_v27, %v618_v27  ;;  %v585_v37 = vmul.f32 %v1543_v1, %v584_v28  ;;  %v319_v25 = vmul.f32 %v1547_v29, %v1889_v0  ;;  %1548 = vrsqrt.f32 %v1898_v26  ;;  %vm598_vm15 = vmor %vm596_vm14, %vm597_vm12 }
 0x1c6   :  { %v317_v39 = vsel %vm316_vm9, %v1541_v61, %v313_v18  ;;  %v592_v43 = vmul.f32 %v1545_v17, %v591_v31  ;;  %1550 = vrsqrt.f32 %v1901_v35  ;;  %vm325_vm13 = vweird.f32 %v1547_v29 }
 0x1c7   :  { %626 = vst [vmem:[#allocation8 + $0x4] sm:$0xf] %v622_v24  ;;  %v339_v45 = vmul.f32 %v317_v39, %v1803_v30  ;;  %v589_v33 = vsel %vm588_vm11, %v1543_v1, %v585_v37  ;;  %v320_v48 = vmul.f32 %v1547_v29, %v319_v25  ;;  %1552 = vrsqrt.f32 %v1909_v41  ;;  %vm326_vm1 = vmor %vm324_vm0, %vm325_vm13 }
 0x1c8   :  { %v611_v54 = vmul.f32 %v589_v33, %v1806_v34  ;;  %v593_v55 = vmul.f32 0.5, %v592_v43  ;;  %v1087_v32 = vpop.xlane.xlu1 %1086  ;;  %vm334_vm4 = vweird.f32 %v1898_v26  ;;  %vm606_vm6 = vweird.f32 %v1901_v35 }
 0x1c9   :  { %v346_v56 = vmul.f32 %v1877_v47, %v339_v45  ;;  %v321_v57 = vmul.f32 0.5, %v320_v48  ;;  %v1094_v51 = vmul.f32 0.0078125, %v1087_v32  ;;  %vm842_vm9 = vweird.f32 %v1909_v41 }
 0x1ca   :  { %v615_v58 = vmul.f32 %v1877_v47, %v611_v54  ;;  %v594_v60 = vsub.f32 1.5, %v593_v55 }
 0x1cb   :  { %v353_v30 = vadd.f32 %v1883_v50, %v346_v56  ;;  %v322_v61 = vsub.f32 1.5, %v321_v57  ;;  %v1915_v1 = vadd.f32 1e-05, %v1094_v51  ;;  %v1549_v34 = vpop.eup %1548 }
 0x1cc   :  { %v619_v4 = vadd.f32 %v1883_v50, %v615_v58  ;;  %v595_v5 = vmul.f32 %v1545_v17, %v594_v60  ;;  %v1551_v20 = vpop.eup %1550  ;;  %v329_v2 = vmul.f32 %v1549_v34, %v1898_v26  ;;  %vm335_vm2 = vweird.f32 %v1549_v34 }
 0x1cd   :  { %v357_v7 = vpack.c.bf16 %v353_v30, %v353_v30  ;;  %v323_v8 = vmul.f32 %v1547_v29, %v322_v61  ;;  %v601_v14 = vmul.f32 %v1551_v20, %v1901_v35  ;;  %1554 = vrsqrt.f32 %v1915_v1  ;;  %v1553_v63 = vpop.eup %1552  ;;  %vm336_vm5 = vmor %vm334_vm4, %vm335_vm2 }
 0x1ce   :  { %v623_v10 = vpack.c.bf16 %v619_v4, %v619_v4  ;;  %v599_v13 = vsel %vm598_vm15, %v1545_v17, %v595_v5  ;;  %v330_v44 = vmul.f32 %v1549_v34, %v329_v2  ;;  %v837_v16 = vmul.f32 %v1553_v63, %v1909_v41 }
 0x1cf   :  { %361 = vst [vmem:[#allocation8 + $0x10] sm:$0xf] %v357_v7  ;;  %v612_v9 = vmul.f32 %v599_v13, %v1816_v42  ;;  %v327_v19 = vsel %vm326_vm1, %v1547_v29, %v323_v8  ;;  %v602_v3 = vmul.f32 %v1551_v20, %v601_v14  ;;  %vm607_vm3 = vweird.f32 %v1551_v20 }
 0x1d0   :  { %627 = vst [vmem:[#allocation8 + $0x14] sm:$0xf] %v623_v10  ;;  %v340_v49 = vmul.f32 %v327_v19, %v1813_v38  ;;  %v823_v0 = vpop.xlane.xlu1 %822  ;;  %v331_v22 = vmul.f32 0.5, %v330_v44  ;;  %v838_v29 = vmul.f32 %v1553_v63, %v837_v16  ;;  %vm608_vm7 = vmor %vm606_vm6, %vm607_vm3  ;;  %vm843_vm8 = vweird.f32 %v1553_v63 }
 0x1d1   :  { %v616_v21 = vmul.f32 %v1877_v47, %v612_v9  ;;  %v603_v17 = vmul.f32 0.5, %v602_v3  ;;  %v829_v27 = vmul.f32 0.0078125, %v823_v0  ;;  %vm844_vm10 = vmor %vm842_vm9, %vm843_vm8  ;;  %vm1108_vm12 = vweird.f32 %v1915_v1 }
 0x1d2   :  { %v347_v23 = vmul.f32 %v1877_v47, %v340_v49  ;;  %v332_v28 = vsub.f32 1.5, %v331_v22  ;;  %v839_v25 = vmul.f32 0.5, %v838_v29 }
 0x1d3   :  { %v620_v42 = vadd.f32 %v1883_v50, %v616_v21  ;;  %v604_v31 = vsub.f32 1.5, %v603_v17  ;;  %v1930_v38 = vadd.f32 1e-05, %v829_v27  ;;  %v1555_v36 = vpop.eup %1554 }
 0x1d4   :  { %v354_v18 = vadd.f32 %v1883_v50, %v347_v23  ;;  %v333_v37 = vmul.f32 %v1549_v34, %v332_v28  ;;  %v1103_v45 = vmul.f32 %v1555_v36, %v1915_v1  ;;  %v840_v48 = vsub.f32 1.5, %v839_v25 }
 0x1d5   :  { %v624_v24 = vpack.c.bf16 %v620_v42, %v620_v42  ;;  %v605_v43 = vmul.f32 %v1551_v20, %v604_v31  ;;  %1556 = vrsqrt.f32 %v1930_v38  ;;  %vm1109_vm11 = vweird.f32 %v1555_v36 }
 0x1d6   :  { %v358_v39 = vpack.c.bf16 %v354_v18, %v354_v18  ;;  %v337_v33 = vsel %vm336_vm5, %v1549_v34, %v333_v37  ;;  %v1104_v26 = vmul.f32 %v1555_v36, %v1103_v45  ;;  %v841_v57 = vmul.f32 %v1553_v63, %v840_v48  ;;  %vm1110_vm13 = vmor %vm1108_vm12, %vm1109_vm11 }
 0x1d7   :  { %628 = vst [vmem:[#allocation8 + $0x24] sm:$0xf] %v624_v24  ;;  %v341_v54 = vmul.f32 %v337_v33, %v1823_v46  ;;  %v609_v55 = vsel %vm608_vm7, %v1551_v20, %v605_v43  ;;  %vm852_vm15 = vweird.f32 %v1930_v38 }
 0x1d8   :  { %362 = vst [vmem:[#allocation8 + $0x20] sm:$0xf] %v358_v39  ;;  %v825_v32 = vpop.xlane.xlu2 %824  ;;  %v613_v56 = vmul.f32 %v609_v55, %v1829_v40  ;;  %v827_v51 = vpop.xlane.xlu0 %826  ;;  %v1105_v60 = vmul.f32 0.5, %v1104_v26  ;;  %v845_v34 = vsel %vm844_vm10, %v1553_v63, %v841_v57 }
 0x1d9   :  { %v830_v35 = vmul.f32 0.0078125, %v825_v32  ;;  %v348_v58 = vmul.f32 %v1877_v47, %v341_v54  ;;  %v831_v30 = vmul.f32 0.0078125, %v827_v51  ;;  %v876_v40 = vmul.f32 %v845_v34, %v1826_v53 }
 0x1da   :  { %v617_v61 = vmul.f32 %v1877_v47, %v613_v56  ;;  %v1106_v5 = vsub.f32 1.5, %v1105_v60 }
 0x1db   :  { %v1941_v46 = vadd.f32 1e-05, %v830_v35  ;;  %v355_v4 = vadd.f32 %v1883_v50, %v348_v58  ;;  %v1945_v20 = vadd.f32 1e-05, %v831_v30  ;;  %v1557_v41 = vpop.eup %1556  ;;  %v880_v2 = vmul.f32 %v1877_v47, %v876_v40 }
 0x1dc   :  { %v621_v7 = vadd.f32 %v1883_v50, %v617_v61  ;;  %v1107_v10 = vmul.f32 %v1555_v36, %v1106_v5  ;;  %v847_v13 = vmul.f32 %v1557_v41, %v1930_v38  ;;  %vm853_vm14 = vweird.f32 %v1557_v41 }
 0x1dd   :  { %1558 = vrsqrt.f32 %v1941_v46  ;;  %v359_v8 = vpack.c.bf16 %v355_v4, %v355_v4  ;;  %v884_v53 = vadd.f32 %v1883_v50, %v880_v2  ;;  %vm854_vm0 = vmor %vm852_vm15, %vm853_vm14  ;;  %vm862_vm2 = vweird.f32 %v1941_v46 }
 0x1de   :  { %v625_v14 = vpack.c.bf16 %v621_v7, %v621_v7  ;;  %1560 = vrsqrt.f32 %v1945_v20  ;;  %v1111_v9 = vsel %vm1110_vm13, %v1555_v36, %v1107_v10  ;;  %v848_v19 = vmul.f32 %v1557_v41, %v847_v13 }
 0x1df   :  { %363 = vst [vmem:[#allocation8 + $0x30] sm:$0xf] %v359_v8  ;;  %v1142_v63 = vmul.f32 %v1111_v9, %v1838_v52  ;;  %v888_v21 = vpack.c.bf16 %v884_v53, %v884_v53  ;;  %vm872_vm5 = vweird.f32 %v1945_v20 }
 0x1e0   :  { %v1089_v44 = vpop.xlane.xlu2 %1088  ;;  %v1093_v1 = vpop.xlane.xlu1 %1092  ;;  %629 = vst [vmem:[#allocation8 + $0x34] sm:$0xf] %v625_v14  ;;  %v849_v22 = vmul.f32 0.5, %v848_v19 }
 0x1e1   :  { %v1095_v49 = vmul.f32 0.0078125, %v1089_v44  ;;  %v1097_v3 = vmul.f32 0.0078125, %v1093_v1  ;;  %v1091_v0 = vpop.xlane.xlu0 %1090  ;;  %v1146_v17 = vmul.f32 %v1877_v47, %v1142_v63  ;;  %892 = vst [vmem:[#allocation8 + $0x8] sm:$0xf] %v888_v21 }
 0x1e2   :  { %v1096_v16 = vmul.f32 0.0078125, %v1091_v0  ;;  %v850_v28 = vsub.f32 1.5, %v849_v22 }
 0x1e3   :  { %v1559_v23 = vpop.eup %1558  ;;  %v1957_v27 = vadd.f32 1e-05, %v1095_v49  ;;  %v1959_v42 = vadd.f32 1e-05, %v1097_v3  ;;  %v1150_v31 = vadd.f32 %v1883_v50, %v1146_v17 }
 0x1e4   :  { %v857_v29 = vmul.f32 %v1559_v23, %v1941_v46  ;;  %v1962_v18 = vadd.f32 1e-05, %v1096_v16  ;;  %v1561_v52 = vpop.eup %1560  ;;  %v851_v36 = vmul.f32 %v1557_v41, %v850_v28  ;;  %vm863_vm1 = vweird.f32 %v1559_v23 }
 0x1e5   :  { %1562 = vrsqrt.f32 %v1957_v27  ;;  %v867_v37 = vmul.f32 %v1561_v52, %v1945_v20  ;;  %v1154_v25 = vpack.c.bf16 %v1150_v31, %v1150_v31  ;;  %vm873_vm3 = vweird.f32 %v1561_v52  ;;  %vm864_vm4 = vmor %vm862_vm2, %vm863_vm1 }
 0x1e6   :  { %v858_v24 = vmul.f32 %v1559_v23, %v857_v29  ;;  %1564 = vrsqrt.f32 %v1959_v42  ;;  %v855_v39 = vsel %vm854_vm0, %v1557_v41, %v851_v36  ;;  %vm874_vm6 = vmor %vm872_vm5, %vm873_vm3  ;;  %vm1118_vm8 = vweird.f32 %v1957_v27 }
 0x1e7   :  { %v868_v45 = vmul.f32 %v1561_v52, %v867_v37  ;;  %1566 = vrsqrt.f32 %v1962_v18  ;;  %1158 = vst [vmem:[#allocation8 + $0xc] sm:$0xf] %v1154_v25  ;;  %v877_v33 = vmul.f32 %v855_v39, %v1843_v62  ;;  %vm1138_vm12 = vweird.f32 %v1959_v42 }
 0x1e8   :  { %v859_v43 = vmul.f32 0.5, %v858_v24  ;;  %vm1128_vm14 = vweird.f32 %v1962_v18 }
 0x1e9   :  { %v869_v54 = vmul.f32 0.5, %v868_v45  ;;  %v881_v38 = vmul.f32 %v1877_v47, %v877_v33 }
 0x1ea   :  { %v860_v48 = vsub.f32 1.5, %v859_v43 }
 0x1eb   :  { %v1563_v55 = vpop.eup %1562  ;;  %v870_v32 = vsub.f32 1.5, %v869_v54  ;;  %v885_v35 = vadd.f32 %v1883_v50, %v881_v38 }
 0x1ec   :  { %v861_v26 = vmul.f32 %v1559_v23, %v860_v48  ;;  %v1113_v56 = vmul.f32 %v1563_v55, %v1957_v27  ;;  %v1565_v57 = vpop.eup %1564  ;;  %vm1119_vm7 = vweird.f32 %v1563_v55 }
 0x1ed   :  { %v1567_v62 = vpop.eup %1566  ;;  %v871_v58 = vmul.f32 %v1561_v52, %v870_v32  ;;  %v1133_v30 = vmul.f32 %v1565_v57, %v1959_v42  ;;  %v889_v61 = vpack.c.bf16 %v885_v35, %v885_v35  ;;  %vm1139_vm9 = vweird.f32 %v1565_v57  ;;  %vm1120_vm10 = vmor %vm1118_vm8, %vm1119_vm7 }
 0x1ee   :  { %v865_v51 = vsel %vm864_vm4, %v1559_v23, %v861_v26  ;;  %v1114_v60 = vmul.f32 %v1563_v55, %v1113_v56  ;;  %v1123_v46 = vmul.f32 %v1567_v62, %v1962_v18  ;;  %vm1129_vm11 = vweird.f32 %v1567_v62  ;;  %vm1140_vm13 = vmor %vm1138_vm12, %vm1139_vm9 }
 0x1ef   :  { %v878_v34 = vmul.f32 %v865_v51, %v1848_v59  ;;  %v875_v4 = vsel %vm874_vm6, %v1561_v52, %v871_v58  ;;  %v1134_v5 = vmul.f32 %v1565_v57, %v1133_v30  ;;  %893 = vst [vmem:[#allocation8 + $0x18] sm:$0xf] %v889_v61  ;;  %vm1130_vm15 = vmor %vm1128_vm14, %vm1129_vm11 }
 0x1f0   :  { %v1115_v40 = vmul.f32 0.5, %v1114_v60  ;;  %v879_v20 = vmul.f32 %v875_v4, %v1851_v6  ;;  %v1124_v7 = vmul.f32 %v1567_v62, %v1123_v46 }
 0x1f1   :  { %v882_v41 = vmul.f32 %v1877_v47, %v878_v34  ;;  %v1135_v2 = vmul.f32 0.5, %v1134_v5 }
 0x1f2   :  { %v1116_v8 = vsub.f32 1.5, %v1115_v40  ;;  %v883_v13 = vmul.f32 %v1877_v47, %v879_v20  ;;  %v1125_v59 = vmul.f32 0.5, %v1124_v7 }
 0x1f3   :  { %v886_v10 = vadd.f32 %v1883_v50, %v882_v41  ;;  %v1136_v53 = vsub.f32 1.5, %v1135_v2 }
 0x1f4   :  { %v1117_v14 = vmul.f32 %v1563_v55, %v1116_v8  ;;  %v887_v19 = vadd.f32 %v1883_v50, %v883_v13  ;;  %v1126_v44 = vsub.f32 1.5, %v1125_v59 }
 0x1f5   :  { %v890_v9 = vpack.c.bf16 %v886_v10, %v886_v10  ;;  %v1137_v1 = vmul.f32 %v1565_v57, %v1136_v53 }
 0x1f6   :  { %v1121_v6 = vsel %vm1120_vm10, %v1563_v55, %v1117_v14  ;;  %v891_v63 = vpack.c.bf16 %v887_v19, %v887_v19  ;;  %v1127_v3 = vmul.f32 %v1567_v62, %v1126_v44 }
 0x1f7   :  { %894 = vst [vmem:[#allocation8 + $0x28] sm:$0xf] %v890_v9  ;;  %v1143_v49 = vmul.f32 %v1121_v6, %v1858_v12  ;;  %v1141_v0 = vsel %vm1140_vm13, %v1565_v57, %v1137_v1 }
 0x1f8   :  { %895 = vst [vmem:[#allocation8 + $0x38] sm:$0xf] %v891_v63  ;;  %v1145_v22 = vmul.f32 %v1141_v0, %v1861_v15  ;;  %v1131_v16 = vsel %vm1130_vm15, %v1567_v62, %v1127_v3 }
 0x1f9   :  { %v1147_v21 = vmul.f32 %v1877_v47, %v1143_v49  ;;  %v1144_v23 = vmul.f32 %v1131_v16, %v1864_v11 }
 0x1fa   :  { %v1149_v27 = vmul.f32 %v1877_v47, %v1145_v22 }
 0x1fb   :  { %v1151_v17 = vadd.f32 %v1883_v50, %v1147_v21  ;;  %v1148_v12 = vmul.f32 %v1877_v47, %v1144_v23 }
 0x1fc   :  { %v1153_v28 = vadd.f32 %v1883_v50, %v1149_v27 }
 0x1fd   :  { %v1155_v42 = vpack.c.bf16 %v1151_v17, %v1151_v17  ;;  %v1152_v15 = vadd.f32 %v1883_v50, %v1148_v12 }
 0x1fe   :  { %v1157_v29 = vpack.c.bf16 %v1153_v28, %v1153_v28 }
 0x1ff   :  { %1159 = vst [vmem:[#allocation8 + $0x1c] sm:$0xf] %v1155_v42  ;;  %v1156_v11 = vpack.c.bf16 %v1152_v15, %v1152_v15 }
 0x200   :  { %1161 = vst [vmem:[#allocation8 + $0x3c] sm:$0xf] %v1157_v29 }
 0x201   :  { %1160 = vst [vmem:[#allocation8 + $0x2c] sm:$0xf] %v1156_v11 }
 0x202   :  { %1174 = dma.vmem_to_hbm [thread:$0]  %s1167_s4, 1024, %s1169_s15, [#allocation4], %s1671_s26, %s1671_s26, %s1672_s27  }
 0x203   :  { %1668 = dma.done.wait [#allocation4], 1024  }
 0x204   :  { %1669 = vsyncadd [#allocation4], 4294966272 }
 0x205   :  { %1179 = vsyncpa [#allocation3], 1 }
 0x206   :  { %1180 = vsyncpa [#allocation6], 1 }
 0x207   :  { %1181 = vsyncpa [#allocation4], 1 }

</bundles_post_ra>
